<compile_context>
chip_gen: v5e
topology: v5e:2x2
jax: 0.10.0
libtpu: 0.0.40
codegen_flags: <defaults>
</compile_context>

<pallas_src>
import jax
import jax.numpy as jnp
from jax.experimental import pallas as pl
from jax.experimental.pallas import tpu as pltpu


def _fullmodel_kernel(x_ref, w1_ref, b1_ref, w2_ref, b2_ref, tgt_ref,
                      nll_ref, logits_ref):
    # x arrives f32 from HBM; cast to bf16 in-register right before the MXU so
    # x's HBM traffic is a single 4 B/elem read (no separate XLA cast pass).
    x_bf16 = x_ref[...].astype(jnp.bfloat16)

    # ---- model forward: relu(x @ W1 + b1) @ W2 + b2 (bf16 MXU, f32 acc) ----
    h = jnp.dot(x_bf16, w1_ref[...], preferred_element_type=jnp.float32)
    h = jnp.maximum(h + b1_ref[...], 0.0)
    logits = jnp.dot(h.astype(jnp.bfloat16), w2_ref[...],
                     preferred_element_type=jnp.float32) + b2_ref[...]
    # Narrow (bf16) writeback for the model outputs; the loss below keeps using
    # the f32 `logits` value already in vregs, so loss numerics are unchanged.
    logits_ref[...] = logits.astype(logits_ref.dtype)

    # ---- cross-entropy epilogue (per-row NLL, f32 throughout) ----
    m = jnp.max(logits, axis=-1, keepdims=True)
    lse = m + jnp.log(jnp.sum(jnp.exp(logits - m), axis=-1, keepdims=True))
    col = jax.lax.broadcasted_iota(jnp.int32, logits.shape, 1)
    picked = jnp.sum(jnp.where(col == tgt_ref[...], logits, 0.0),
                     axis=-1, keepdims=True)
    nll_ref[...] = lse - picked
    # TODO(synk): if a bundle dump shows vst saturation, emit NLL lane-dense
    # ((nb, tb) with (1, tb) blocks) instead of this (tb, 1) column.


def _invariant_spec(block_shape):
    """Grid-invariant block (index_map always (0, 0)): single-buffer it so its
    resident VMEM footprint is 1x instead of the default 2x."""
    idx = lambda i: (0, 0)
    try:
        return pl.BlockSpec(block_shape, idx, pipeline_mode=pl.Buffered(1))
    except (TypeError, ValueError):  # older jax without pipeline_mode support
        return pl.BlockSpec(block_shape, idx)


def _vmem_limit_bytes(tb, D, H, C, logits_bytes):
    """Actual pipelined-buffer requirement + headroom, capped at ~75% of
    physical VMEM so the request also fits v7x's 64 MiB/TC."""
    need = (
        tb * D * 4 * 2                      # f32 x tile, double-buffered
        + tb * 4 * 2                        # int32 targets tile, double-buffered
        + (D * H + H * C) * 2               # bf16 weights, single-buffered
        + (H + C) * 4                       # f32 biases
        + tb * C * logits_bytes * 2         # logits tile, double-buffered
        + tb * 4 * 2                        # NLL tile, double-buffered
    )
    need = int(need * 1.25) + (4 << 20)     # 25% headroom + Mosaic scratch
    try:
        cap = (pltpu.get_tpu_info().vmem_capacity_bytes * 3) // 4
    except Exception:                       # conservative: 75% of v7x's 64 MiB
        cap = 48 << 20
    return max(min(need, cap), 32 << 20)


def full_model_forward(targets, x, w1, b1, w2, b2, *, tb=256,
                       logits_dtype=jnp.bfloat16):
    """Returns (loss_unsqueezed[1], logits[B, C]) — mirrors FullModel.forward."""
    B, D = x.shape
    H = w1.shape[1]
    C = w2.shape[1]
    # TODO(synk): for LM-head-sized C or very large D, add an "arbitrary" C-tile
    # axis (online-softmax m/l scratch for the LSE) and a K-tile axis with an
    # f32 VMEM accumulator so weights stream instead of staying fully resident.

    nb = pl.cdiv(B, tb)          # no jnp.pad: the ragged last tile is handled
                                 # by Pallas' masked partial-block stores.

    # Weights feed the MXU in bf16 (halves weight DMA); x stays f32 in HBM and
    # is cast in-kernel. Biases and the whole loss epilogue stay f32.
    w1b = w1.astype(jnp.bfloat16).reshape(D, H)
    w2b = w2.astype(jnp.bfloat16).reshape(H, C)
    b1f = b1.astype(jnp.float32).reshape(1, H)
    b2f = b2.astype(jnp.float32).reshape(1, C)
    xf = x.astype(jnp.float32)
    tgt2d = targets.astype(jnp.int32).reshape(B, 1)

    logits_bytes = jnp.dtype(logits_dtype).itemsize
    cost = pl.CostEstimate(
        flops=2 * B * (D * H + H * C),
        transcendentals=B * C,
        bytes_accessed=(xf.size * 4 + w1b.size * 2 + w2b.size * 2
                        + b1f.size * 4 + b2f.size * 4 + tgt2d.size * 4
                        + B * C * logits_bytes + B * 4),
    )

    nll, logits = pl.pallas_call(
        _fullmodel_kernel,
        out_shape=(
            jax.ShapeDtypeStruct((B, 1), jnp.float32),    # per-row NLL
            jax.ShapeDtypeStruct((B, C), logits_dtype),   # model outputs
        ),
        grid_spec=pltpu.PrefetchScalarGridSpec(
            num_scalar_prefetch=0,
            grid=(nb,),
            in_specs=[
                pl.BlockSpec((tb, D), lambda i: (i, 0)),   # x tile (f32)
                _invariant_spec((D, H)),                   # W1 (bf16)
                _invariant_spec((1, H)),                   # b1 (f32)
                _invariant_spec((H, C)),                   # W2 (bf16)
                _invariant_spec((1, C)),                   # b2 (f32)
                pl.BlockSpec((tb, 1), lambda i: (i, 0)),   # int targets tile
            ],
            out_specs=(
                pl.BlockSpec((tb, 1), lambda i: (i, 0)),   # NLL tile
                pl.BlockSpec((tb, C), lambda i: (i, 0)),   # logits tile
            ),
        ),
        compiler_params=pltpu.CompilerParams(
            # TODO(synk): on v7x, verify the batch axis is actually sharded over
            # both TensorCores; if a trace shows one TC doing all steps, switch
            # to pltpu.CORE_PARALLEL (or pl.core_map over a tensorcore mesh).
            dimension_semantics=("parallel",),
            vmem_limit_bytes=_vmem_limit_bytes(tb, D, H, C, logits_bytes),
        ),
        cost_estimate=cost,
    )(xf, w1b, b1f, w2b, b2f, tgt2d)

    loss = jnp.sum(nll[:, 0]) / B            # mean reduction over the batch
    return loss[None], logits


def _reference(targets, x, w1, b1, w2, b2):
    # Same bf16-MXU / f32-accumulation recipe as the kernel; logits kept f32
    # here so the comparison tolerance only reflects the bf16 writeback.
    xb = x.astype(jnp.bfloat16)
    w1b = w1.astype(jnp.bfloat16)
    w2b = w2.astype(jnp.bfloat16)
    h = jnp.maximum(
        jnp.dot(xb, w1b, preferred_element_type=jnp.float32) + b1.reshape(1, -1),
        0.0)
    logits = jnp.dot(h.astype(jnp.bfloat16), w2b,
                     preferred_element_type=jnp.float32) + b2.reshape(1, -1)
    lse = jax.scipy.special.logsumexp(logits, axis=-1)
    picked = jnp.take_along_axis(logits, targets[:, None], axis=-1)[:, 0]
    loss = jnp.mean(lse - picked)
    return loss[None], logits


if __name__ == "__main__":
    # Lane-dense feature dims (multiples of 128). B is deliberately NOT a
    # multiple of the 256-row batch tile so the un-padded ragged last block
    # (masked partial stores) is exercised.
    B, D, H, C = 320, 128, 256, 128
    key = jax.random.PRNGKey(0)
    k_x, k_w1, k_b1, k_w2, k_b2, k_t = jax.random.split(key, 6)

    x = jax.random.normal(k_x, (B, D), dtype=jnp.float32)
    w1 = jax.random.normal(k_w1, (D, H), dtype=jnp.float32) * 0.1
    b1 = jax.random.normal(k_b1, (H,), dtype=jnp.float32) * 0.01
    w2 = jax.random.normal(k_w2, (H, C), dtype=jnp.float32) * 0.1
    b2 = jax.random.normal(k_b2, (C,), dtype=jnp.float32) * 0.01
    targets = jax.random.randint(k_t, (B,), 0, C, dtype=jnp.int32)

    loss, logits = jax.block_until_ready(
        jax.jit(full_model_forward)(targets, x, w1, b1, w2, b2))

    ref_loss, ref_logits = _reference(targets, x, w1, b1, w2, b2)
    assert loss.shape == (1,) and logits.shape == (B, C)
    assert logits.dtype == jnp.bfloat16
    assert jnp.allclose(loss, ref_loss, atol=1e-3, rtol=1e-3)
    assert jnp.allclose(logits.astype(jnp.float32), ref_logits,
                        atol=2e-2, rtol=2e-2)   # bf16 writeback tolerance

    print("KERNEL_OK")
</pallas_src>

<mosaic_0001>
module attributes {stable_mosaic.version = 11 : i64} {
  func.func @_fullmodel_kernel(%arg0: i32, %arg1: memref<256x128xf32, #tpu.memory_space<vmem>>, %arg2: memref<128x256xbf16, #tpu.memory_space<vmem>>, %arg3: memref<1x256xf32, #tpu.memory_space<vmem>>, %arg4: memref<256x128xbf16, #tpu.memory_space<vmem>>, %arg5: memref<1x128xf32, #tpu.memory_space<vmem>>, %arg6: memref<256x1xi32, #tpu.memory_space<vmem>>, %arg7: memref<256x1xf32, #tpu.memory_space<vmem>>, %arg8: memref<256x128xbf16, #tpu.memory_space<vmem>>) attributes {dimension_semantics = [#tpu.dimension_semantics<parallel>], iteration_bounds = array<i64: 2>, scalar_prefetch = 0 : i64, scratch_operands = 0 : i64, tpu.core_type = #tpu.core_type<tc>, window_params = [{transform_indices = @transform_0, window_bounds = array<i64: 256, 128>}, {pipeline_mode = #tpu.pipeline_mode<synchronous>, transform_indices = @transform_1, window_bounds = array<i64: 128, 256>}, {pipeline_mode = #tpu.pipeline_mode<synchronous>, transform_indices = @transform_2, window_bounds = array<i64: 1, 256>}, {pipeline_mode = #tpu.pipeline_mode<synchronous>, transform_indices = @transform_3, window_bounds = array<i64: 256, 128>}, {pipeline_mode = #tpu.pipeline_mode<synchronous>, transform_indices = @transform_4, window_bounds = array<i64: 1, 128>}, {transform_indices = @transform_5, window_bounds = array<i64: 256, 1>}, {transform_indices = @transform_6, window_bounds = array<i64: 256, 1>}, {transform_indices = @transform_7, window_bounds = array<i64: 256, 128>}]} {
    %c0 = arith.constant 0 : index
    %c0_0 = arith.constant 0 : index
    %0 = vector.load %arg1[%c0, %c0_0] : memref<256x128xf32, #tpu.memory_space<vmem>>, vector<256x128xf32>
    %1 = arith.truncf %0 : vector<256x128xf32> to vector<256x128xbf16>
    %c0_1 = arith.constant 0 : index
    %c0_2 = arith.constant 0 : index
    %2 = vector.load %arg2[%c0_1, %c0_2] : memref<128x256xbf16, #tpu.memory_space<vmem>>, vector<128x256xbf16>
    %cst = arith.constant dense<0.000000e+00> : vector<256x256xf32>
    %3 = tpu.matmul %1, %2, %cst {dimension_numbers = #tpu.dot_dimension_numbers<[1], [0], [0], [1], [0, 0, 1, 1], [], []>} : vector<256x128xbf16>, vector<128x256xbf16>, vector<256x256xf32> -> vector<256x256xf32>
    %c0_3 = arith.constant 0 : index
    %c0_4 = arith.constant 0 : index
    %4 = vector.load %arg3[%c0_3, %c0_4] : memref<1x256xf32, #tpu.memory_space<vmem>>, vector<1x256xf32>
    %5 = vector.broadcast %4 : vector<1x256xf32> to vector<256x256xf32>
    %6 = arith.addf %3, %5 : vector<256x256xf32>
    %cst_5 = arith.constant 0.000000e+00 : f32
    %7 = vector.broadcast %cst_5 : f32 to vector<256x256xf32>
    %8 = arith.maximumf %6, %7 : vector<256x256xf32>
    %9 = arith.truncf %8 : vector<256x256xf32> to vector<256x256xbf16>
    %c0_6 = arith.constant 0 : index
    %c0_7 = arith.constant 0 : index
    %10 = vector.load %arg4[%c0_6, %c0_7] : memref<256x128xbf16, #tpu.memory_space<vmem>>, vector<256x128xbf16>
    %cst_8 = arith.constant dense<0.000000e+00> : vector<256x128xf32>
    %11 = tpu.matmul %9, %10, %cst_8 {dimension_numbers = #tpu.dot_dimension_numbers<[1], [0], [0], [1], [0, 0, 1, 1], [], []>} : vector<256x256xbf16>, vector<256x128xbf16>, vector<256x128xf32> -> vector<256x128xf32>
    %c0_9 = arith.constant 0 : index
    %c0_10 = arith.constant 0 : index
    %12 = vector.load %arg5[%c0_9, %c0_10] : memref<1x128xf32, #tpu.memory_space<vmem>>, vector<1x128xf32>
    %13 = vector.broadcast %12 : vector<1x128xf32> to vector<256x128xf32>
    %14 = arith.addf %11, %13 : vector<256x128xf32>
    %15 = arith.truncf %14 : vector<256x128xf32> to vector<256x128xbf16>
    %c0_11 = arith.constant 0 : index
    %c0_12 = arith.constant 0 : index
    %16 = vector.load %arg8[%c0_11, %c0_12] : memref<256x128xbf16, #tpu.memory_space<vmem>>, vector<256x128xbf16>
    tpu.vector_store %arg8[%c0_11, %c0_12], %15 {strides = array<i32>} : memref<256x128xbf16, #tpu.memory_space<vmem>>, vector<256x128xbf16>,
    %cst_13 = arith.constant dense<0xFF800000> : vector<256xf32>
    %17 = vector.multi_reduction <maximumf>, %14, %cst_13 [1] : vector<256x128xf32> to vector<256xf32>
    %18 = vector.shape_cast %17 : vector<256xf32> to vector<256x1xf32>
    %19 = vector.broadcast %18 : vector<256x1xf32> to vector<256x128xf32>
    %20 = arith.subf %14, %19 : vector<256x128xf32>
    %21 = math.exp %20 : vector<256x128xf32>
    %cst_14 = arith.constant dense<0.000000e+00> : vector<256xf32>
    %22 = vector.multi_reduction <add>, %21, %cst_14 [1] : vector<256x128xf32> to vector<256xf32>
    %23 = vector.shape_cast %22 : vector<256xf32> to vector<256x1xf32>
    %24 = math.log %23 : vector<256x1xf32>
    %25 = arith.addf %18, %24 : vector<256x1xf32>
    %26 = tpu.iota {dimensions = array<i32: 1>} : vector<256x128xi32>
    %c0_15 = arith.constant 0 : index
    %c0_16 = arith.constant 0 : index
    %27 = vector.load %arg6[%c0_15, %c0_16] : memref<256x1xi32, #tpu.memory_space<vmem>>, vector<256x1xi32>
    %28 = vector.broadcast %27 : vector<256x1xi32> to vector<256x128xi32>
    %29 = arith.cmpi eq, %26, %28 : vector<256x128xi32>
    %cst_17 = arith.constant 0.000000e+00 : f32
    %30 = vector.broadcast %cst_17 : f32 to vector<256x128xf32>
    %31 = arith.select %29, %14, %30 : vector<256x128xi1>, vector<256x128xf32>
    %cst_18 = arith.constant dense<0.000000e+00> : vector<256xf32>
    %32 = vector.multi_reduction <add>, %31, %cst_18 [1] : vector<256x128xf32> to vector<256xf32>
    %33 = vector.shape_cast %32 : vector<256xf32> to vector<256x1xf32>
    %34 = arith.subf %25, %33 : vector<256x1xf32>
    %c0_19 = arith.constant 0 : index
    %c0_20 = arith.constant 0 : index
    %35 = vector.load %arg7[%c0_19, %c0_20] : memref<256x1xf32, #tpu.memory_space<vmem>>, vector<256x1xf32>
    tpu.vector_store %arg7[%c0_19, %c0_20], %34 {strides = array<i32>} : memref<256x1xf32, #tpu.memory_space<vmem>>, vector<256x1xf32>,
    return
  }
  func.func @transform_0(%arg0: i32) -> (i32, i32) {
    %c0_i32 = arith.constant 0 : i32
    %c0_i32_0 = arith.constant 0 : i32
    return %arg0, %c0_i32 : i32, i32
  }
  func.func @transform_1(%arg0: i32) -> (i32, i32) {
    %c0_i32 = arith.constant 0 : i32
    %c0_i32_0 = arith.constant 0 : i32
    %c0_i32_1 = arith.constant 0 : i32
    return %c0_i32, %c0_i32_0 : i32, i32
  }
  func.func @transform_2(%arg0: i32) -> (i32, i32) {
    %c0_i32 = arith.constant 0 : i32
    %c0_i32_0 = arith.constant 0 : i32
    %c0_i32_1 = arith.constant 0 : i32
    return %c0_i32, %c0_i32_0 : i32, i32
  }
  func.func @transform_3(%arg0: i32) -> (i32, i32) {
    %c0_i32 = arith.constant 0 : i32
    %c0_i32_0 = arith.constant 0 : i32
    %c0_i32_1 = arith.constant 0 : i32
    return %c0_i32, %c0_i32_0 : i32, i32
  }
  func.func @transform_4(%arg0: i32) -> (i32, i32) {
    %c0_i32 = arith.constant 0 : i32
    %c0_i32_0 = arith.constant 0 : i32
    %c0_i32_1 = arith.constant 0 : i32
    return %c0_i32, %c0_i32_0 : i32, i32
  }
  func.func @transform_5(%arg0: i32) -> (i32, i32) {
    %c0_i32 = arith.constant 0 : i32
    %c0_i32_0 = arith.constant 0 : i32
    return %arg0, %c0_i32 : i32, i32
  }
  func.func @transform_6(%arg0: i32) -> (i32, i32) {
    %c0_i32 = arith.constant 0 : i32
    %c0_i32_0 = arith.constant 0 : i32
    return %arg0, %c0_i32 : i32, i32
  }
  func.func @transform_7(%arg0: i32) -> (i32, i32) {
    %c0_i32 = arith.constant 0 : i32
    %c0_i32_0 = arith.constant 0 : i32
    return %arg0, %c0_i32 : i32, i32
  }
}

</mosaic_0001>

<bundles_post_ra>
// kernel: full_model_forward.1
= control target key start
LH: loop header
LB: loop body
LE: loop exit
PB: predicated region body
PF: predicated region fallthrough
CT: control target
= control target key end

     0   :  { %s4096_s0 = inlined_call_operand.vmem [shape: f32[320,128], index: 0, kind: input, shape index: {}]   ;;  %s4097_s1 = inlined_call_operand.vmem [shape: bf16[128,256], index: 1, kind: input, shape index: {}]   ;;  %s4098_s2 = inlined_call_operand.vmem [shape: f32[1,256], index: 2, kind: input, shape index: {}]   ;;  %s4099_s3 = inlined_call_operand.vmem [shape: bf16[256,128], index: 3, kind: input, shape index: {}]   ;;  %s4100_s4 = inlined_call_operand.vmem [shape: f32[1,128], index: 4, kind: input, shape index: {}]   ;;  %s4101_s5 = inlined_call_operand.vmem [shape: s32[320,1], index: 5, kind: input, shape index: {}]   ;;  %s4102_s6 = inlined_call_operand.vmem [shape: f32[320,1], index: 6, kind: output, shape index: {0}]   ;;  %s4103_s7 = inlined_call_operand.hbm [shape: bf16[320,128], index: 7, kind: output, shape index: {1}]  }
   0x1   :  { %4104 = sst [smem:[#allocation10_spill]] %s4096_s0 }
   0x2   :  { %4105 = sst [smem:[#allocation11_spill]] %s4097_s1 }
   0x3   :  { %4106 = sst [smem:[#allocation12_spill]] %s4098_s2 }
   0x4   :  { %4107 = sst [smem:[#allocation13_spill]] %s4099_s3 }
   0x5   :  { %4108 = sst [smem:[#allocation14_spill]] %s4100_s4 }
   0x6   :  { %13 = vsyncpa [#allocation4], 0 }
   0x7   :  { %15 = vsyncpa [#allocation4 + $0x1], 0  ;;  %s2927_s24 = smov 0   ;;  %s2929_s25 = smov 0  }
   0x8   :  { %s2931_s26 = smov 0   ;;  %s2933_s27 = smov 0  }
   0x9 LB: > { %s2948_s28 = sadd.s32 4294967295, %s2849_s27   ;;  %s2213_s29 = sadd.s32 4294967294, %s2849_s27   ;;  %s2849_s27 = sphi %s2933_s27, %s4135_s27   ;;  %s2845_s26 = sphi %s2931_s26, %s4134_s26   ;;  %s2841_s25 = sphi %s2929_s25, %s4133_s25   ;;  %s2837_s24 = sphi %s2927_s24, %s4132_s24  }
   0xa   : > { %s2952_s30 = sadd.s32 1, %s2849_s27   ;;  %s164_s8 = sadd.s32 1, %s2845_s26 }
   0xb   : > { %s161_s9 = ssub.s32 %s2849_s27, %s2952_s30  ;;  %p174_p0 = scmp.ne.s32.totalorder %s2845_s26, %s2841_s25 }
   0xc   : > { %p162_p1 = scmp.eq.s32.totalorder %s161_s9, 0  ;;  %p175_p2 = scmp.eq.s32.totalorder %s2948_s28, 1 }
   0xd   : > { %p206_p3 = scmp.ne.s32.totalorder %s2841_s25, %s2837_s24  ;;  %p207_p4 = scmp.eq.s32.totalorder %s2213_s29, 1 }
   0xe   : > { %s2963_s10 = scalar_select %p162_p1, %s2845_s26, %s164_s8  }
   0xf   : > { %p2965_p5 = por %p175_p2, %p174_p0  ;;  %p2969_p6 = por %p207_p4, %p206_p3 }
  0x10   : > { %p2216_p7 = scmp.ge.s32.totalorder %s2849_s27, 1  ;;  %p271_p8 = scmp.lt.s32.totalorder %s2849_s27, 3 }
  0x12   : > { %p272_p9 = pnand %p2216_p7, %p271_p8 }
  0x14   : > { %275 = sbr.rel (%p272_p9) target bundleno = 952 (0x3b8), region = 44 }
  0x19   : > { %s4111_s1 = sld [smem:[#allocation11_spill]]  ;;  %s3024_s17 = sshll.u32 %s2948_s28, 5  ;;  %v2883_v61 = vmov 0  }
  0x1a   : > { %p325_p10 = scmp.lt.s32.totalorder %s3024_s17, 39  ;;  %s4112_s0 = sld [smem:[#allocation10_spill]]  ;;  %2612 = vset.pattern.permute.xlu2 %v2883_v61  ;;  %2611 = vset.pattern.permute.xlu1 %v2883_v61 }
  0x1b   : > { %2613 = vset.pattern.permute.xlu0 %v2883_v61  ;;  %s4113_s3 = sld [smem:[#allocation13_spill]]  ;;  %s1812_s18 = ssub.s32 (%p2965_p5), 40, %s3024_s17 }
  0x1c   : > { %s3052_s21 = scalar_select %p325_p10, %s3024_s17, 39 }
  0x1d   : > { %s4114_s2 = sld [smem:[#allocation12_spill]]  ;;  %s2407_s19 = sshll.u32 (%p2965_p5), %s2948_s28, 8 }
  0x1e   : > { %s2220_s16 = sshll.u32 %s3052_s21, 3  ;;  %s4115_s4 = sld [smem:[#allocation14_spill]] }
  0x1f   : > { %v2281_v0 = vld [vmem:[%s4111_s1 + $0x70] sm:$0xf]  ;;  %v2390_v1 = vld [vmem:[%s4111_s1 + $0x74] sm:$0xf0]  ;;  %v2389_v2 = vld [vmem:[%s4111_s1 + $0x74] sm:$0xf]  ;;  %s3099_s20 = scalar_lea.vmem %s4101_s5, %s2220_s16 }
  0x20   : > { %v2282_v3 = vor.u32 %v2390_v1, %v2281_v0  ;;  %v2283_v4 = vld [vmem:[%s4111_s1 + $0x78] sm:$0xf0]  ;;  %v2273_v5 = vld [vmem:[%s4111_s1 + $0x60] sm:$0xf]  ;;  %v2388_v6 = vld [vmem:[%s4111_s1 + $0x64] sm:$0xf0]  ;;  %s3078_s8 = scalar_lea.vmem %s4112_s0, %s2220_s16  ;;  %s3910_s16 = scalar_lea.vmem (%p2965_p5), %s4102_s6, %s2407_s19  }
  0x21   : > { %v2286_v7 = vor.u32 %v2389_v2, %v2283_v4  ;;  %v2387_v8 = vld [vmem:[%s4111_s1 + $0x64] sm:$0xf]  ;;  %v2275_v9 = vld [vmem:[%s4111_s1 + $0x68] sm:$0xf0]  ;;  %v2274_v10 = vor.u32 %v2388_v6, %v2273_v5  ;;  %v2265_v12 = vld [vmem:[%s4111_s1 + $0x50] sm:$0xf] }
  0x22   : > { %508 = vmatpush.bf16.msra.mxu0 %v2282_v3  ;;  %v2278_v11 = vor.u32 %v2387_v8, %v2275_v9  ;;  %v2386_v13 = vld [vmem:[%s4111_s1 + $0x54] sm:$0xf0]  ;;  %v2385_v14 = vld [vmem:[%s4111_s1 + $0x54] sm:$0xf]  ;;  %v2267_v15 = vld [vmem:[%s4111_s1 + $0x58] sm:$0xf0] }
  0x23   : > { %597 = vmatpush.bf16.msra.mxu1 %v2286_v7  ;;  %v2266_v16 = vor.u32 %v2386_v13, %v2265_v12  ;;  %v2270_v17 = vor.u32 %v2385_v14, %v2267_v15  ;;  %v2257_v18 = vld [vmem:[%s4111_s1 + $0x40] sm:$0xf]  ;;  %v2384_v19 = vld [vmem:[%s4111_s1 + $0x44] sm:$0xf0]  ;;  %v2383_v20 = vld [vmem:[%s4111_s1 + $0x44] sm:$0xf] }
  0x24   : > { %v2259_v21 = vld [vmem:[%s4111_s1 + $0x48] sm:$0xf0]  ;;  %v2258_v22 = vor.u32 %v2384_v19, %v2257_v18  ;;  %v2249_v24 = vld [vmem:[%s4111_s1 + $0x30] sm:$0xf]  ;;  %v2382_v25 = vld [vmem:[%s4111_s1 + $0x34] sm:$0xf0] }
  0x25   : > { %v2262_v23 = vor.u32 %v2383_v20, %v2259_v21  ;;  %v2381_v26 = vld [vmem:[%s4111_s1 + $0x34] sm:$0xf]  ;;  %v2251_v27 = vld [vmem:[%s4111_s1 + $0x38] sm:$0xf0]  ;;  %v2250_v28 = vor.u32 %v2382_v25, %v2249_v24  ;;  %v2241_v30 = vld [vmem:[%s4111_s1 + $0x20] sm:$0xf] }
  0x26   : > { %509 = vmatpush.bf16.msra.mxu0 %v2274_v10  ;;  %v2254_v29 = vor.u32 %v2381_v26, %v2251_v27  ;;  %v2380_v31 = vld [vmem:[%s4111_s1 + $0x24] sm:$0xf0]  ;;  %v2379_v32 = vld [vmem:[%s4111_s1 + $0x24] sm:$0xf]  ;;  %v2243_v33 = vld [vmem:[%s4111_s1 + $0x28] sm:$0xf0] }
  0x27   : > { %598 = vmatpush.bf16.msra.mxu1 %v2278_v11  ;;  %v2242_v34 = vor.u32 %v2380_v31, %v2241_v30  ;;  %v2246_v35 = vor.u32 %v2379_v32, %v2243_v33  ;;  %v2233_v36 = vld [vmem:[%s4111_s1 + $0x10] sm:$0xf]  ;;  %v2378_v37 = vld [vmem:[%s4111_s1 + $0x14] sm:$0xf0]  ;;  %v2377_v38 = vld [vmem:[%s4111_s1 + $0x14] sm:$0xf] }
  0x28   : > { %v2235_v39 = vld [vmem:[%s4111_s1 + $0x18] sm:$0xf0]  ;;  %v2234_v40 = vor.u32 %v2378_v37, %v2233_v36  ;;  %v2225_v42 = vld [vmem:[%s4111_s1] sm:$0xf]  ;;  %v2376_v43 = vld [vmem:[%s4111_s1 + $0x4] sm:$0xf0] }
  0x29   : > { %v2238_v41 = vor.u32 %v2377_v38, %v2235_v39  ;;  %v2375_v44 = vld [vmem:[%s4111_s1 + $0x4] sm:$0xf]  ;;  %v2227_v45 = vld [vmem:[%s4111_s1 + $0x8] sm:$0xf0]  ;;  %v2226_v46 = vor.u32 %v2376_v43, %v2225_v42  ;;  %v360_v51 = vld [vmem:[%s3078_s8 + $0x10] sm:$0xff]  ;;  %p1813_p11 = scmp.lt.s32.totalorder (%p2965_p5), %s1812_s18, 32 }
  0x2a   : > { %510 = vmatpush.bf16.msra.mxu0 %v2266_v16  ;;  %v358_v47 = vld [vmem:[%s3078_s8] sm:$0xff]  ;;  %v359_v48 = vld [vmem:[%s3078_s8 + $0x8] sm:$0xff]  ;;  %v2230_v49 = vor.u32 %v2375_v44, %v2227_v45  ;;  %v361_v52 = vld [vmem:[%s3078_s8 + $0x18] sm:$0xff] }
  0x2b   : > { %599 = vmatpush.bf16.msra.mxu1 %v2270_v17  ;;  %v390_v50 = vpack.c.bf16 %v359_v48, %v358_v47  ;;  %v391_v53 = vpack.c.bf16 %v361_v52, %v360_v51  ;;  %v362_v54 = vld [vmem:[%s3078_s8 + $0x20] sm:$0xff]  ;;  %v363_v55 = vld [vmem:[%s3078_s8 + $0x28] sm:$0xff]  ;;  %v364_v57 = vld [vmem:[%s3078_s8 + $0x30] sm:$0xff] }
  0x2c   : > { %v392_v56 = vpack.c.bf16 %v363_v55, %v362_v54  ;;  %v365_v58 = vld [vmem:[%s3078_s8 + $0x38] sm:$0xff]  ;;  %v1479_v60 = vld [vmem:[%s3099_s20 + $0x8] sm:$0xff]  ;;  %v366_v62 = vld [vmem:[%s3078_s8 + $0x40] sm:$0xff] }
  0x2d   : > { %v393_v59 = vpack.c.bf16 %v365_v58, %v364_v57  ;;  %1514 = vperm.xlu2 %2612, %v1479_v60   ;;  %v367_v63 = vld [vmem:[%s3078_s8 + $0x48] sm:$0xff]  ;;  %v1478_v1 = vld [vmem:[%s3099_s20] sm:$0xff]  ;;  %v1481_v2 = vld [vmem:[%s3099_s20 + $0x18] sm:$0xff] }
  0x2e   : > { %511 = vmatpush.bf16.msra.mxu0 %v2258_v22  ;;  %v394_v0 = vpack.c.bf16 %v367_v63, %v366_v62  ;;  %1511 = vperm.xlu1 %2611, %v1478_v1   ;;  %v2398_v3 = vld [vmem:[%s4113_s3 + $0x38] sm:$0xff]  ;;  %v1482_v5 = vld [vmem:[%s3099_s20 + $0x20] sm:$0xff]  ;;  %v1483_v6 = vld [vmem:[%s3099_s20 + $0x28] sm:$0xff] }
  0x2f   : > { %600 = vmatpush.bf16.msra.mxu1 %v2262_v23  ;;  %v2406_v4 = vld [vmem:[%s4113_s3 + $0x78] sm:$0xff]  ;;  %914 = vmatpush.bf16.msra.mxu2 %v2398_v3  ;;  %v368_v7 = vld [vmem:[%s3078_s8 + $0x50] sm:$0xff]  ;;  %v2396_v14 = vld [vmem:[%s4113_s3 + $0x28] sm:$0xff] }
  0x30   : > { %1003 = vmatpush.bf16.msra.mxu3 %v2406_v4  ;;  %v369_v8 = vld [vmem:[%s3078_s8 + $0x58] sm:$0xff]  ;;  %v2397_v10 = vld [vmem:[%s4113_s3 + $0x30] sm:$0xff]  ;;  %v2404_v15 = vld [vmem:[%s4113_s3 + $0x68] sm:$0xff] }
  0x31   : > { %v395_v9 = vpack.c.bf16 %v369_v8, %v368_v7  ;;  %v2405_v11 = vld [vmem:[%s4113_s3 + $0x70] sm:$0xff]  ;;  %v1485_v13 = vld [vmem:[%s3099_s20 + $0x38] sm:$0xff]  ;;  %v2395_v17 = vld [vmem:[%s4113_s3 + $0x20] sm:$0xff] }
  0x32   : > { %512 = vmatpush.bf16.msra.mxu0 %v2250_v28  ;;  %v1484_v12 = vld [vmem:[%s3099_s20 + $0x30] sm:$0xff]  ;;  %v2403_v18 = vld [vmem:[%s4113_s3 + $0x60] sm:$0xff]  ;;  %v371_v22 = vld [vmem:[%s3078_s8 + $0x68] sm:$0xff] }
  0x33   : > { %601 = vmatpush.bf16.msra.mxu1 %v2254_v29  ;;  %915 = vmatpush.bf16.msra.mxu2 %v2397_v10  ;;  %v1480_v16 = vld [vmem:[%s3099_s20 + $0x10] sm:$0xff]  ;;  %v1486_v19 = vld [vmem:[%s3099_s20 + $0x40] sm:$0xff]  ;;  %v2394_v24 = vld [vmem:[%s4113_s3 + $0x18] sm:$0xff] }
  0x34   : > { %1004 = vmatpush.bf16.msra.mxu3 %v2405_v11  ;;  %1517 = vperm.xlu0 %2613, %v1480_v16   ;;  %v1488_v20 = vld [vmem:[%s3099_s20 + $0x50] sm:$0xff]  ;;  %v370_v21 = vld [vmem:[%s3078_s8 + $0x60] sm:$0xff]  ;;  %v2402_v25 = vld [vmem:[%s4113_s3 + $0x58] sm:$0xff] }
  0x35   : > { %1520 = vperm.xlu2 %2612, %v1481_v2   ;;  %v396_v23 = vpack.c.bf16 %v371_v22, %v370_v21  ;;  %v2393_v26 = vld [vmem:[%s4113_s3 + $0x10] sm:$0xff]  ;;  %v1487_v28 = vld [vmem:[%s3099_s20 + $0x48] sm:$0xff]  ;;  %v1489_v29 = vld [vmem:[%s3099_s20 + $0x58] sm:$0xff] }
  0x36   : > { %513 = vmatpush.bf16.msra.mxu0 %v2242_v34  ;;  %1523 = vperm.xlu1 %2611, %v1482_v5   ;;  %v2401_v27 = vld [vmem:[%s4113_s3 + $0x50] sm:$0xff]  ;;  %v1491_v30 = vld [vmem:[%s3099_s20 + $0x68] sm:$0xff]  ;;  %v373_v34 = vld [vmem:[%s3078_s8 + $0x78] sm:$0xff] }
  0x37   : > { %602 = vmatpush.bf16.msra.mxu1 %v2246_v35  ;;  %916 = vmatpush.bf16.msra.mxu2 %v2396_v14  ;;  %v2392_v31 = vld [vmem:[%s4113_s3 + $0x8] sm:$0xff]  ;;  %v372_v33 = vld [vmem:[%s3078_s8 + $0x70] sm:$0xff]  ;;  %v2391_v35 = vld [vmem:[%s4113_s3] sm:$0xff] }
  0x38   : > { %1005 = vmatpush.bf16.msra.mxu3 %v2404_v15  ;;  %v2400_v32 = vld [vmem:[%s4113_s3 + $0x48] sm:$0xff]  ;;  %v2399_v36 = vld [vmem:[%s4113_s3 + $0x40] sm:$0xff]  ;;  %v1492_v38 = vld [vmem:[%s3099_s20 + $0x70] sm:$0xff] }
  0x39   : > { %v1490_v37 = vld [vmem:[%s3099_s20 + $0x60] sm:$0xff]  ;;  %v1495_v42 = vld [vmem:[%s3099_s20 + $0x88] sm:$0xff]  ;;  %v1497_v43 = vld [vmem:[%s3099_s20 + $0x98] sm:$0xff] }
  0x3a   : > { %514 = vmatpush.bf16.msra.mxu0 %v2234_v40  ;;  %v1494_v39 = vld [vmem:[%s3099_s20 + $0x80] sm:$0xff]  ;;  %v397_v40 = vpack.c.bf16 %v373_v34, %v372_v33  ;;  %v375_v45 = vld [vmem:[%s3078_s8 + $0x88] sm:$0xff]  ;;  %v1500_v48 = vld [vmem:[%s3099_s20 + $0xb0] sm:$0xff] }
  0x3b   : > { %603 = vmatpush.bf16.msra.mxu1 %v2238_v41  ;;  %917 = vmatpush.bf16.msra.mxu2 %v2395_v17  ;;  %v1493_v41 = vld [vmem:[%s3099_s20 + $0x78] sm:$0xff]  ;;  %v374_v44 = vld [vmem:[%s3078_s8 + $0x80] sm:$0xff]  ;;  %v1499_v55 = vld [vmem:[%s3099_s20 + $0xa8] sm:$0xff] }
  0x3c   : > { %1006 = vmatpush.bf16.msra.mxu3 %v2403_v18  ;;  %1538 = vperm.xlu0 %2613, %v1487_v28   ;;  %v1498_v47 = vld [vmem:[%s3099_s20 + $0xa0] sm:$0xff]  ;;  %v1503_v57 = vld [vmem:[%s3099_s20 + $0xc8] sm:$0xff]  ;;  %v376_v2 = vld [vmem:[%s3078_s8 + $0x90] sm:$0xff] }
  0x3d   : > { %1526 = vperm.xlu2 %2612, %v1483_v6   ;;  %v377_v3 = vld [vmem:[%s3078_s8 + $0x98] sm:$0xff]  ;;  %v1502_v6 = vld [vmem:[%s3099_s20 + $0xc0] sm:$0xff]  ;;  %v1504_v7 = vld [vmem:[%s3099_s20 + $0xd0] sm:$0xff] }
  0x3e   : > { %515 = vmatpush.bf16.msra.mxu0 %v2226_v46  ;;  %1529 = vperm.xlu1 %2611, %v1484_v12   ;;  %v1496_v46 = vld [vmem:[%s3099_s20 + $0x90] sm:$0xff]  ;;  %v1506_v8 = vld [vmem:[%s3099_s20 + $0xe0] sm:$0xff]  ;;  %v399_v11 = vpack.c.bf16 %v377_v3, %v376_v2  ;;  %v1505_v14 = vld [vmem:[%s3099_s20 + $0xd8] sm:$0xff] }
  0x3f   : > { %604 = vmatpush.bf16.msra.mxu1 %v2230_v49  ;;  %918 = vmatpush.bf16.msra.mxu2 %v2394_v24  ;;  %v398_v49 = vpack.c.bf16 %v375_v45, %v374_v44  ;;  %v1507_v15 = vld [vmem:[%s3099_s20 + $0xe8] sm:$0xff]  ;;  %v1509_v16 = vld [vmem:[%s3099_s20 + $0xf8] sm:$0xff]  ;;  %v380_v45 = vld [vmem:[%s3078_s8 + $0xb0] sm:$0xff] }
  0x40   : > { %1007 = vmatpush.bf16.msra.mxu3 %v2402_v25  ;;  %v379_v28 = vld [vmem:[%s3078_s8 + $0xa8] sm:$0xff] }
  0x41   : > { %516 = vmatmul.bf16.vlgmr.msra.gmra.mxu0 %v390_v50 }
  0x42   : > { %605 = vmatmul.bf16.vlgmr.msra.gmra.mxu1 %v390_v50  ;;  %v422_v50 = vld [vmem:[%s4114_s2] sm:$0x3] }
  0x43   : > { %919 = vmatpush.bf16.msra.mxu2 %v2393_v26  ;;  %v3186_v54 = vperm.slane %v422_v50, 1 }
  0x44   : > { %1008 = vmatpush.bf16.msra.mxu3 %v2401_v27  ;;  %1547 = vperm.xlu0 %2613, %v1490_v37   ;;  %v378_v27 = vld [vmem:[%s3078_s8 + $0xa0] sm:$0xff] }
  0x45   : > { %1532 = vperm.xlu2 %2612, %v1485_v13  }
  0x46   : > { %1535 = vperm.xlu1 %2611, %v1486_v19  }
  0x47   : > { %920 = vmatpush.bf16.msra.mxu2 %v2392_v31 }
  0x48   : > { %1009 = vmatpush.bf16.msra.mxu3 %v2400_v32  ;;  %v400_v32 = vpack.c.bf16 %v379_v28, %v378_v27 }
  0x4b   : > { %921 = vmatpush.bf16.msra.mxu2 %v2391_v35 }
  0x4c   : > { %1010 = vmatpush.bf16.msra.mxu3 %v2399_v36  ;;  %1556 = vperm.xlu0 %2613, %v1493_v41  }
  0x4d   : > { %1541 = vperm.xlu2 %2612, %v1488_v20  }
  0x4e   : > { %1544 = vperm.xlu1 %2611, %v1489_v29   ;;  %v1508_v29 = vld [vmem:[%s3099_s20 + $0xf0] sm:$0xff] }
  0x51   : > { %521 = vmatmul.bf16.gmra.mxu0 %v391_v53 }
  0x52   : > { %610 = vmatmul.bf16.gmra.mxu1 %v391_v53  ;;  %v3184_v53 = vperm.slane %v422_v50, 0 }
  0x54   : > { %1565 = vperm.xlu0 %2613, %v1496_v46   ;;  %v381_v46 = vld [vmem:[%s3078_s8 + $0xb8] sm:$0xff] }
  0x55   : > { %1550 = vperm.xlu2 %2612, %v1491_v30  }
  0x56   : > { %1553 = vperm.xlu1 %2611, %v1492_v38  }
  0x5c   : > { %1574 = vperm.xlu0 %2613, %v1499_v55  }
  0x5d   : > { %1559 = vperm.xlu2 %2612, %v1494_v39  }
  0x5e   : > { %1562 = vperm.xlu1 %2611, %v1495_v42  }
  0x61   : > { %526 = vmatmul.bf16.gmra.mxu0 %v392_v56 }
  0x62   : > { %615 = vmatmul.bf16.gmra.mxu1 %v392_v56  ;;  %v1501_v56 = vld [vmem:[%s3099_s20 + $0xb8] sm:$0xff]  ;;  %s3235_s20 = sand.u32 1, %s2841_s25  }
  0x63   : > { %s2218_s22 = sshll.u32 %s3235_s20, 7  ;;  %s2217_s13 = sshll.u32 %s3235_s20, 8 }
  0x64   : > { %1583 = vperm.xlu0 %2613, %v1502_v6   ;;  %s3275_s23 = scalar_lea.vmem [#allocation3], %s2218_s22  ;;  %s3683_s14 = scalar_lea.vmem [#allocation2], %s2217_s13  }
  0x65   : > { %1568 = vperm.xlu2 %2612, %v1497_v43  }
  0x66   : > { %1571 = vperm.xlu1 %2611, %v1498_v47  }
  0x6c   : > { %1592 = vperm.xlu0 %2613, %v1505_v14  }
  0x6d   : > { %1577 = vperm.xlu2 %2612, %v1500_v48  }
  0x6e   : > { %1580 = vperm.xlu1 %2611, %v1501_v56  }
  0x71   : > { %531 = vmatmul.bf16.gmra.mxu0 %v393_v59 }
  0x72   : > { %620 = vmatmul.bf16.gmra.mxu1 %v393_v59 }
  0x74   : > { %1601 = vperm.xlu0 %2613, %v1508_v29  }
  0x75   : > { %1586 = vperm.xlu2 %2612, %v1503_v57  }
  0x76   : > { %1589 = vperm.xlu1 %2611, %v1504_v7  }
  0x7d   : > { %1595 = vperm.xlu2 %2612, %v1506_v8  }
  0x7e   : > { %1598 = vperm.xlu1 %2611, %v1507_v15  }
  0x81   : > { %536 = vmatmul.bf16.gmra.mxu0 %v394_v0 }
  0x82   : > { %625 = vmatmul.bf16.gmra.mxu1 %v394_v0 }
  0x85   : > { %1604 = vperm.xlu2 %2612, %v1509_v16  }
  0x91   : > { %541 = vmatmul.bf16.gmra.mxu0 %v395_v9 }
  0x92   : > { %630 = vmatmul.bf16.gmra.mxu1 %v395_v9 }
  0xa1   : > { %546 = vmatmul.bf16.gmra.mxu0 %v396_v23 }
  0xa2   : > { %635 = vmatmul.bf16.gmra.mxu1 %v396_v23 }
  0xb1   : > { %551 = vmatmul.bf16.gmra.mxu0 %v397_v40 }
  0xb2   : > { %640 = vmatmul.bf16.gmra.mxu1 %v397_v40 }
  0xbe   : > { %v517_v51 = vpop.f32.mrf.mxu0 }
  0xbf   : > { %v606_v52 = vpop.f32.mrf.mxu1  ;;  %v518_v58 = vadd.f32 %v517_v51, %v3184_v53 }
  0xc0   : > { %v607_v59 = vadd.f32 %v606_v52, %v3186_v54 }
  0xc1   : > { %556 = vmatmul.bf16.gmra.mxu0 %v398_v49  ;;  %v686_v0 = vmax.f32 %v518_v58, 0.0 }
  0xc2   : > { %645 = vmatmul.bf16.gmra.mxu1 %v398_v49  ;;  %v687_v4 = vmax.f32 %v607_v59, 0.0  ;;  %v401_v49 = vpack.c.bf16 %v381_v46, %v380_v45 }
  0xc6   : > { %v519_v60 = vpop.f32.mrf.mxu0 }
  0xc7   : > { %v520_v61 = vadd.f32 %v519_v60, %v3184_v53  ;;  %v608_v62 = vpop.f32.mrf.mxu1 }
  0xc8   : > { %v609_v63 = vadd.f32 %v608_v62, %v3186_v54 }
  0xc9   : > { %v688_v1 = vmax.f32 %v520_v61, 0.0 }
  0xca   : > { %v689_v5 = vmax.f32 %v609_v63, 0.0 }
  0xcb   : > { %v750_v9 = vpack.c.bf16 %v688_v1, %v686_v0  ;;  %v382_v0 = vld [vmem:[%s3078_s8 + $0xc0] sm:$0xff]  ;;  %v383_v1 = vld [vmem:[%s3078_s8 + $0xc8] sm:$0xff] }
  0xcc   : > { %v751_v10 = vpack.c.bf16 %v689_v5, %v687_v4  ;;  %v402_v4 = vpack.c.bf16 %v383_v1, %v382_v0 }
  0xcd   : > { %922 = vmatmul.bf16.vlgmr.msra.gmra.mxu2 %v750_v9 }
  0xce   : > { %1011 = vmatmul.bf16.vlgmr.msra.gmra.mxu3 %v751_v10  ;;  %v522_v12 = vpop.f32.mrf.mxu0 }
  0xcf   : > { %v611_v13 = vpop.f32.mrf.mxu1  ;;  %v523_v17 = vadd.f32 %v522_v12, %v3184_v53 }
  0xd0   : > { %v612_v18 = vadd.f32 %v611_v13, %v3186_v54 }
  0xd1   : > { %561 = vmatmul.bf16.gmra.mxu0 %v399_v11  ;;  %v690_v23 = vmax.f32 %v523_v17, 0.0  ;;  %v384_v17 = vld [vmem:[%s3078_s8 + $0xd0] sm:$0xff] }
  0xd2   : > { %650 = vmatmul.bf16.gmra.mxu1 %v399_v11  ;;  %v691_v25 = vmax.f32 %v612_v18, 0.0  ;;  %v385_v18 = vld [vmem:[%s3078_s8 + $0xd8] sm:$0xff] }
  0xd6   : > { %v524_v19 = vpop.f32.mrf.mxu0 }
  0xd7   : > { %v525_v20 = vadd.f32 %v524_v19, %v3184_v53  ;;  %v613_v21 = vpop.f32.mrf.mxu1 }
  0xd8   : > { %v614_v22 = vadd.f32 %v613_v21, %v3186_v54  ;;  %v403_v21 = vpack.c.bf16 %v385_v18, %v384_v17 }
  0xd9   : > { %v692_v24 = vmax.f32 %v525_v20, 0.0 }
  0xda   : > { %v693_v26 = vmax.f32 %v614_v22, 0.0 }
  0xdb   : > { %v752_v30 = vpack.c.bf16 %v692_v24, %v690_v23 }
  0xdc   : > { %v753_v31 = vpack.c.bf16 %v693_v26, %v691_v25 }
  0xdd   : > { %927 = vmatmul.bf16.gmra.mxu2 %v752_v30 }
  0xde   : > { %1016 = vmatmul.bf16.gmra.mxu3 %v753_v31  ;;  %v527_v33 = vpop.f32.mrf.mxu0 }
  0xdf   : > { %v616_v34 = vpop.f32.mrf.mxu1  ;;  %v528_v35 = vadd.f32 %v527_v33, %v3184_v53 }
  0xe0   : > { %v617_v36 = vadd.f32 %v616_v34, %v3186_v54  ;;  %v386_v34 = vld [vmem:[%s3078_s8 + $0xe0] sm:$0xff] }
  0xe1   : > { %566 = vmatmul.bf16.gmra.mxu0 %v400_v32  ;;  %v694_v41 = vmax.f32 %v528_v35, 0.0  ;;  %v387_v35 = vld [vmem:[%s3078_s8 + $0xe8] sm:$0xff] }
  0xe2   : > { %655 = vmatmul.bf16.gmra.mxu1 %v400_v32  ;;  %v695_v43 = vmax.f32 %v617_v36, 0.0 }
  0xe6   : > { %v529_v37 = vpop.f32.mrf.mxu0 }
  0xe7   : > { %v530_v38 = vadd.f32 %v529_v37, %v3184_v53  ;;  %v618_v39 = vpop.f32.mrf.mxu1 }
  0xe8   : > { %v619_v40 = vadd.f32 %v618_v39, %v3186_v54 }
  0xe9   : > { %v696_v42 = vmax.f32 %v530_v38, 0.0  ;;  %v404_v38 = vpack.c.bf16 %v387_v35, %v386_v34 }
  0xea   : > { %v697_v44 = vmax.f32 %v619_v40, 0.0 }
  0xeb   : > { %v754_v47 = vpack.c.bf16 %v696_v42, %v694_v41 }
  0xec   : > { %v755_v48 = vpack.c.bf16 %v697_v44, %v695_v43 }
  0xed   : > { %932 = vmatmul.bf16.gmra.mxu2 %v754_v47 }
  0xee   : > { %1021 = vmatmul.bf16.gmra.mxu3 %v755_v48  ;;  %v532_v50 = vpop.f32.mrf.mxu0 }
  0xef   : > { %v621_v51 = vpop.f32.mrf.mxu1  ;;  %v533_v52 = vadd.f32 %v532_v50, %v3184_v53 }
  0xf0   : > { %v622_v55 = vadd.f32 %v621_v51, %v3186_v54  ;;  %v388_v51 = vld [vmem:[%s3078_s8 + $0xf0] sm:$0xff] }
  0xf1   : > { %571 = vmatmul.bf16.gmra.mxu0 %v401_v49  ;;  %v698_v60 = vmax.f32 %v533_v52, 0.0  ;;  %v389_v52 = vld [vmem:[%s3078_s8 + $0xf8] sm:$0xff] }
  0xf2   : > { %660 = vmatmul.bf16.gmra.mxu1 %v401_v49  ;;  %v699_v62 = vmax.f32 %v622_v55, 0.0 }
  0xf6   : > { %v534_v56 = vpop.f32.mrf.mxu0 }
  0xf7   : > { %v535_v57 = vadd.f32 %v534_v56, %v3184_v53  ;;  %v623_v58 = vpop.f32.mrf.mxu1 }
  0xf8   : > { %v624_v59 = vadd.f32 %v623_v58, %v3186_v54 }
  0xf9   : > { %v700_v61 = vmax.f32 %v535_v57, 0.0  ;;  %v405_v57 = vpack.c.bf16 %v389_v52, %v388_v51 }
  0xfa   : > { %v701_v63 = vmax.f32 %v624_v59, 0.0 }
  0xfb   : > { %v756_v2 = vpack.c.bf16 %v700_v61, %v698_v60 }
  0xfc   : > { %v757_v3 = vpack.c.bf16 %v701_v63, %v699_v62 }
  0xfd   : > { %937 = vmatmul.bf16.gmra.mxu2 %v756_v2 }
  0xfe   : > { %1026 = vmatmul.bf16.gmra.mxu3 %v757_v3  ;;  %v537_v5 = vpop.f32.mrf.mxu0 }
  0xff   : > { %v626_v6 = vpop.f32.mrf.mxu1  ;;  %v538_v7 = vadd.f32 %v537_v5, %v3184_v53 }
 0x100   : > { %v627_v8 = vadd.f32 %v626_v6, %v3186_v54 }
 0x101   : > { %576 = vmatmul.bf16.gmra.mxu0 %v402_v4  ;;  %v702_v13 = vmax.f32 %v538_v7, 0.0 }
 0x102   : > { %665 = vmatmul.bf16.gmra.mxu1 %v402_v4  ;;  %v703_v15 = vmax.f32 %v627_v8, 0.0 }
 0x106   : > { %v539_v9 = vpop.f32.mrf.mxu0 }
 0x107   : > { %v540_v10 = vadd.f32 %v539_v9, %v3184_v53  ;;  %v628_v11 = vpop.f32.mrf.mxu1 }
 0x108   : > { %v629_v12 = vadd.f32 %v628_v11, %v3186_v54 }
 0x109   : > { %v704_v14 = vmax.f32 %v540_v10, 0.0 }
 0x10a   : > { %v705_v16 = vmax.f32 %v629_v12, 0.0 }
 0x10b   : > { %v758_v19 = vpack.c.bf16 %v704_v14, %v702_v13 }
 0x10c   : > { %v759_v20 = vpack.c.bf16 %v705_v16, %v703_v15 }
 0x10d   : > { %942 = vmatmul.bf16.gmra.mxu2 %v758_v19 }
 0x10e   : > { %1031 = vmatmul.bf16.gmra.mxu3 %v759_v20  ;;  %v542_v22 = vpop.f32.mrf.mxu0 }
 0x10f   : > { %v631_v23 = vpop.f32.mrf.mxu1  ;;  %v543_v24 = vadd.f32 %v542_v22, %v3184_v53 }
 0x110   : > { %v632_v25 = vadd.f32 %v631_v23, %v3186_v54  ;;  %v3254_v23 = vld [vmem:[%s4115_s4] ss:$0 sm:$0xff] }
 0x111   : > { %581 = vmatmul.bf16.gmra.mxu0 %v403_v21  ;;  %v706_v30 = vmax.f32 %v543_v24, 0.0 }
 0x112   : > { %670 = vmatmul.bf16.gmra.mxu1 %v403_v21  ;;  %v707_v32 = vmax.f32 %v632_v25, 0.0  ;;  %v1476_v21 = vlaneseq }
 0x116   : > { %v544_v26 = vpop.f32.mrf.mxu0 }
 0x117   : > { %v545_v27 = vadd.f32 %v544_v26, %v3184_v53  ;;  %v633_v28 = vpop.f32.mrf.mxu1  ;;  %v3256_v26 = vand.u32 127, %v1476_v21 }
 0x118   : > { %v634_v29 = vadd.f32 %v633_v28, %v3186_v54  ;;  %v1512_v28 = vpop.permute.xlu1 %1511 }
 0x119   : > { %v708_v31 = vmax.f32 %v545_v27, 0.0  ;;  %vm1606_vm0 = vcmp.eq.s32.totalorder %v3256_v26, %v1512_v28 }
 0x11a   : > { %v709_v33 = vmax.f32 %v634_v29, 0.0 }
 0x11b   : > { %v760_v36 = vpack.c.bf16 %v708_v31, %v706_v30 }
 0x11c   : > { %v761_v37 = vpack.c.bf16 %v709_v33, %v707_v32 }
 0x11d   : > { %947 = vmatmul.bf16.gmra.mxu2 %v760_v36 }
 0x11e   : > { %1036 = vmatmul.bf16.gmra.mxu3 %v761_v37  ;;  %v547_v39 = vpop.f32.mrf.mxu0 }
 0x11f   : > { %v636_v40 = vpop.f32.mrf.mxu1  ;;  %v548_v41 = vadd.f32 %v547_v39, %v3184_v53 }
 0x120   : > { %v637_v42 = vadd.f32 %v636_v40, %v3186_v54 }
 0x121   : > { %586 = vmatmul.bf16.gmra.mxu0 %v404_v38  ;;  %v710_v47 = vmax.f32 %v548_v41, 0.0 }
 0x122   : > { %675 = vmatmul.bf16.gmra.mxu1 %v404_v38  ;;  %v711_v49 = vmax.f32 %v637_v42, 0.0 }
 0x126   : > { %v549_v43 = vpop.f32.mrf.mxu0 }
 0x127   : > { %v550_v44 = vadd.f32 %v549_v43, %v3184_v53  ;;  %v638_v45 = vpop.f32.mrf.mxu1 }
 0x128   : > { %v639_v46 = vadd.f32 %v638_v45, %v3186_v54 }
 0x129   : > { %v712_v48 = vmax.f32 %v550_v44, 0.0 }
 0x12a   : > { %v713_v50 = vmax.f32 %v639_v46, 0.0 }
 0x12b   : > { %v762_v55 = vpack.c.bf16 %v712_v48, %v710_v47 }
 0x12c   : > { %v763_v56 = vpack.c.bf16 %v713_v50, %v711_v49 }
 0x12d   : > { %952 = vmatmul.bf16.gmra.mxu2 %v762_v55  ;;  %v1518_v55 = vpop.permute.xlu0 %1517 }
 0x12e   : > { %1041 = vmatmul.bf16.gmra.mxu3 %v763_v56  ;;  %v552_v58 = vpop.f32.mrf.mxu0  ;;  %vm1608_vm1 = vcmp.eq.s32.totalorder %v3256_v26, %v1518_v55 }
 0x12f   : > { %v641_v59 = vpop.f32.mrf.mxu1  ;;  %v553_v60 = vadd.f32 %v552_v58, %v3184_v53  ;;  %v1515_v58 = vpop.permute.xlu2 %1514 }
 0x130   : > { %v642_v61 = vadd.f32 %v641_v59, %v3186_v54  ;;  %vm1607_vm2 = vcmp.eq.s32.totalorder %v3256_v26, %v1515_v58 }
 0x131   : > { %591 = vmatmul.bf16.gmra.mxu0 %v405_v57  ;;  %v714_v2 = vmax.f32 %v553_v60, 0.0 }
 0x132   : > { %680 = vmatmul.bf16.gmra.mxu1 %v405_v57  ;;  %v715_v4 = vmax.f32 %v642_v61, 0.0 }
 0x136   : > { %v554_v62 = vpop.f32.mrf.mxu0 }
 0x137   : > { %v555_v63 = vadd.f32 %v554_v62, %v3184_v53  ;;  %v643_v0 = vpop.f32.mrf.mxu1 }
 0x138   : > { %v644_v1 = vadd.f32 %v643_v0, %v3186_v54 }
 0x139   : > { %v716_v3 = vmax.f32 %v555_v63, 0.0 }
 0x13a   : > { %v717_v5 = vmax.f32 %v644_v1, 0.0 }
 0x13b   : > { %v764_v6 = vpack.c.bf16 %v716_v3, %v714_v2 }
 0x13c   : > { %v765_v7 = vpack.c.bf16 %v717_v5, %v715_v4 }
 0x13d   : > { %957 = vmatmul.bf16.gmra.mxu2 %v764_v6 }
 0x13e   : > { %1046 = vmatmul.bf16.gmra.mxu3 %v765_v7  ;;  %v557_v8 = vpop.f32.mrf.mxu0 }
 0x13f   : > { %v646_v9 = vpop.f32.mrf.mxu1  ;;  %v558_v10 = vadd.f32 %v557_v8, %v3184_v53 }
 0x140   : > { %v647_v11 = vadd.f32 %v646_v9, %v3186_v54 }
 0x141   : > { %v718_v16 = vmax.f32 %v558_v10, 0.0 }
 0x142   : > { %v719_v18 = vmax.f32 %v647_v11, 0.0 }
 0x146   : > { %v559_v12 = vpop.f32.mrf.mxu0 }
 0x147   : > { %v560_v13 = vadd.f32 %v559_v12, %v3184_v53  ;;  %v648_v14 = vpop.f32.mrf.mxu1 }
 0x148   : > { %v649_v15 = vadd.f32 %v648_v14, %v3186_v54 }
 0x149   : > { %v720_v17 = vmax.f32 %v560_v13, 0.0 }
 0x14a   : > { %v721_v19 = vmax.f32 %v649_v15, 0.0 }
 0x14b   : > { %v766_v20 = vpack.c.bf16 %v720_v17, %v718_v16  ;;  %v1524_v16 = vpop.permute.xlu1 %1523 }
 0x14c   : > { %v767_v22 = vpack.c.bf16 %v721_v19, %v719_v18  ;;  %v1521_v19 = vpop.permute.xlu2 %1520  ;;  %vm1610_vm4 = vcmp.eq.s32.totalorder %v3256_v26, %v1524_v16 }
 0x14d   : > { %962 = vmatmul.bf16.gmra.mxu2 %v766_v20  ;;  %vm1609_vm3 = vcmp.eq.s32.totalorder %v3256_v26, %v1521_v19 }
 0x14e   : > { %1051 = vmatmul.bf16.gmra.mxu3 %v767_v22  ;;  %v562_v24 = vpop.f32.mrf.mxu0 }
 0x14f   : > { %v651_v25 = vpop.f32.mrf.mxu1  ;;  %v563_v32 = vadd.f32 %v562_v24, %v3184_v53 }
 0x150   : > { %v923_v27 = vpop.f32.mrf.mxu2  ;;  %v652_v34 = vadd.f32 %v651_v25, %v3186_v54 }
 0x151   : > { %v924_v29 = vadd.f32 %v3254_v23, %v923_v27  ;;  %v1012_v30 = vpop.f32.mrf.mxu3  ;;  %v722_v40 = vmax.f32 %v563_v32, 0.0 }
 0x152   : > { %v723_v44 = vmax.f32 %v652_v34, 0.0 }
 0x153   : > { %v3260_v31 = vadd.f32 %v1012_v30, %v924_v29  ;;  %v1530_v34 = vpop.permute.xlu1 %1529 }
 0x154   : > { %vm1612_vm6 = vcmp.eq.s32.totalorder %v3256_v26, %v1530_v34 }
 0x155   : > { %1156 = vmax.xlane.f32.xlu0 %v3260_v31  ;;  %v1638_v33 = vsel %vm1606_vm0, %v3260_v31, 0.0 }
 0x156   : > { %v564_v35 = vpop.f32.mrf.mxu0  ;;  %1670 = vadd.xlane.f32.xlu1 %v1638_v33 }
 0x157   : > { %v565_v36 = vadd.f32 %v564_v35, %v3184_v53  ;;  %v653_v37 = vpop.f32.mrf.mxu1 }
 0x158   : > { %v654_v38 = vadd.f32 %v653_v37, %v3186_v54  ;;  %v925_v39 = vpop.f32.mrf.mxu2 }
 0x159   : > { %v724_v41 = vmax.f32 %v565_v36, 0.0  ;;  %v926_v42 = vadd.f32 %v3254_v23, %v925_v39  ;;  %v1014_v43 = vpop.f32.mrf.mxu3  ;;  %v3308_v39 = vpop.permute.xlu0 %1538 }
 0x15a   : > { %v725_v45 = vmax.f32 %v654_v38, 0.0  ;;  %vm1615_vm9 = vcmp.eq.s32.totalorder %v3256_v26, %v3308_v39 }
 0x15b   : > { %v3270_v46 = vadd.f32 %v1014_v43, %v926_v42  ;;  %v768_v47 = vpack.c.bf16 %v724_v41, %v722_v40  ;;  %v1527_v42 = vpop.permute.xlu2 %1526 }
 0x15c   : > { %v769_v48 = vpack.c.bf16 %v725_v45, %v723_v44  ;;  %vm1611_vm5 = vcmp.eq.s32.totalorder %v3256_v26, %v1527_v42 }
 0x15d   : > { %v2414_v49 = vpack.c.bf16 %v3270_v46, %v3260_v31  ;;  %967 = vmatmul.bf16.gmra.mxu2 %v768_v47  ;;  %1158 = vmax.xlane.f32.xlu0 %v3270_v46  ;;  %v1639_v60 = vsel %vm1607_vm2, %v3270_v46, 0.0 }
 0x15e   : > { %1056 = vmatmul.bf16.gmra.mxu3 %v769_v48  ;;  %v567_v50 = vpop.f32.mrf.mxu0 }
 0x15f   : > { %2415 = vst [vmem:[%s3275_s23] sm:$0xff] %v2414_v49   ;;  %v656_v51 = vpop.f32.mrf.mxu1  ;;  %v568_v61 = vadd.f32 %v567_v50, %v3184_v53 }
 0x160   : > { %v928_v52 = vpop.f32.mrf.mxu2  ;;  %v657_v63 = vadd.f32 %v656_v51, %v3186_v54 }
 0x161   : > { %v929_v56 = vadd.f32 %v3254_v23, %v928_v52  ;;  %v1017_v57 = vpop.f32.mrf.mxu3  ;;  %v726_v5 = vmax.f32 %v568_v61, 0.0 }
 0x162   : > { %v727_v9 = vmax.f32 %v657_v63, 0.0 }
 0x163   : > { %v3281_v59 = vadd.f32 %v1017_v57, %v929_v56  ;;  %v1536_v57 = vpop.permute.xlu1 %1535 }
 0x164   : > { %vm1614_vm8 = vcmp.eq.s32.totalorder %v3256_v26, %v1536_v57 }
 0x165   : > { %1672 = vadd.xlane.f32.xlu0 %v1639_v60  ;;  %1160 = vmax.xlane.f32.xlu1 %v3281_v59  ;;  %v1640_v62 = vsel %vm1608_vm1, %v3281_v59, 0.0  ;;  %v3323_v60 = vpop.permute.xlu0 %1547 }
 0x166   : > { %v569_v0 = vpop.f32.mrf.mxu0  ;;  %1674 = vadd.xlane.f32.xlu2 %v1640_v62  ;;  %vm1618_vm12 = vcmp.eq.s32.totalorder %v3256_v26, %v3323_v60 }
 0x167   : > { %v570_v1 = vadd.f32 %v569_v0, %v3184_v53  ;;  %v658_v2 = vpop.f32.mrf.mxu1 }
 0x168   : > { %v659_v3 = vadd.f32 %v658_v2, %v3186_v54  ;;  %v930_v4 = vpop.f32.mrf.mxu2 }
 0x169   : > { %v728_v6 = vmax.f32 %v570_v1, 0.0  ;;  %v931_v7 = vadd.f32 %v3254_v23, %v930_v4  ;;  %v1019_v8 = vpop.f32.mrf.mxu3 }
 0x16a   : > { %v729_v10 = vmax.f32 %v659_v3, 0.0  ;;  %v1533_v3 = vpop.permute.xlu2 %1532 }
 0x16b   : > { %v3291_v11 = vadd.f32 %v1019_v8, %v931_v7  ;;  %v770_v12 = vpack.c.bf16 %v728_v6, %v726_v5  ;;  %vm1613_vm7 = vcmp.eq.s32.totalorder %v3256_v26, %v1533_v3  ;;  %v3336_v16 = vpop.permute.xlu1 %1544 }
 0x16c   : > { %v771_v13 = vpack.c.bf16 %v729_v10, %v727_v9  ;;  %vm1617_vm11 = vcmp.eq.s32.totalorder %v3256_v26, %v3336_v16 }
 0x16d   : > { %v2419_v14 = vpack.c.bf16 %v3291_v11, %v3281_v59  ;;  %972 = vmatmul.bf16.gmra.mxu2 %v770_v12  ;;  %1162 = vmax.xlane.f32.xlu1 %v3291_v11  ;;  %v1641_v24 = vsel %vm1609_vm3, %v3291_v11, 0.0  ;;  %v3341_v19 = vpop.permute.xlu0 %1556 }
 0x16e   : > { %1061 = vmatmul.bf16.gmra.mxu3 %v771_v13  ;;  %v572_v15 = vpop.f32.mrf.mxu0  ;;  %vm1621_vm15 = vcmp.eq.s32.totalorder %v3256_v26, %v3341_v19 }
 0x16f   : > { %2491 = vst [vmem:[%s3275_s23 + $0x8] sm:$0xff] %v2419_v14   ;;  %v661_v17 = vpop.f32.mrf.mxu1  ;;  %v573_v25 = vadd.f32 %v572_v15, %v3184_v53 }
 0x170   : > { %v933_v18 = vpop.f32.mrf.mxu2  ;;  %v662_v27 = vadd.f32 %v661_v17, %v3186_v54 }
 0x171   : > { %v934_v20 = vadd.f32 %v3254_v23, %v933_v18  ;;  %v1022_v21 = vpop.f32.mrf.mxu3  ;;  %v730_v35 = vmax.f32 %v573_v25, 0.0 }
 0x172   : > { %v731_v40 = vmax.f32 %v662_v27, 0.0 }
 0x173   : > { %v3299_v22 = vadd.f32 %v1022_v21, %v934_v20 }
 0x175   : > { %1164 = vmax.xlane.f32.xlu2 %v3299_v22  ;;  %1676 = vadd.xlane.f32.xlu1 %v1641_v24  ;;  %v1642_v47 = vsel %vm1610_vm4, %v3299_v22, 0.0 }
 0x176   : > { %v574_v28 = vpop.f32.mrf.mxu0 }
 0x177   : > { %v575_v29 = vadd.f32 %v574_v28, %v3184_v53  ;;  %v663_v30 = vpop.f32.mrf.mxu1  ;;  %v1542_v28 = vpop.permute.xlu2 %1541 }
 0x178   : > { %v664_v32 = vadd.f32 %v663_v30, %v3186_v54  ;;  %v935_v33 = vpop.f32.mrf.mxu2  ;;  %vm1616_vm10 = vcmp.eq.s32.totalorder %v3256_v26, %v1542_v28 }
 0x179   : > { %v732_v36 = vmax.f32 %v575_v29, 0.0  ;;  %v936_v37 = vadd.f32 %v3254_v23, %v935_v33  ;;  %v1024_v38 = vpop.f32.mrf.mxu3 }
 0x17a   : > { %v733_v41 = vmax.f32 %v664_v32, 0.0 }
 0x17b   : > { %v3311_v43 = vadd.f32 %v1024_v38, %v936_v37  ;;  %v772_v44 = vpack.c.bf16 %v732_v36, %v730_v35  ;;  %v3353_v35 = vpop.permute.xlu1 %1553  ;;  %v3356_v38 = vpop.permute.xlu0 %1565 }
 0x17c   : > { %v773_v45 = vpack.c.bf16 %v733_v41, %v731_v40  ;;  %vm1620_vm14 = vcmp.eq.s32.totalorder %v3256_v26, %v3353_v35  ;;  %vm1624_vm2 = vcmp.eq.s32.totalorder %v3256_v26, %v3356_v38 }
 0x17d   : > { %v2424_v48 = vpack.c.bf16 %v3311_v43, %v3299_v22  ;;  %977 = vmatmul.bf16.gmra.mxu2 %v772_v44  ;;  %1678 = vadd.xlane.f32.xlu2 %v1642_v47  ;;  %v1643_v49 = vsel %vm1611_vm5, %v3311_v43, 0.0 }
 0x17e   : > { %1066 = vmatmul.bf16.gmra.mxu3 %v773_v45  ;;  %v577_v50 = vpop.f32.mrf.mxu0  ;;  %1680 = vadd.xlane.f32.xlu0 %v1643_v49 }
 0x17f   : > { %2492 = vst [vmem:[%s3275_s23 + $0x10] sm:$0xff] %v2424_v48   ;;  %v666_v51 = vpop.f32.mrf.mxu1  ;;  %v578_v61 = vadd.f32 %v577_v50, %v3184_v53 }
 0x180   : > { %v938_v52 = vpop.f32.mrf.mxu2  ;;  %v667_v63 = vadd.f32 %v666_v51, %v3186_v54 }
 0x181   : > { %v939_v55 = vadd.f32 %v3254_v23, %v938_v52  ;;  %v1027_v56 = vpop.f32.mrf.mxu3  ;;  %v734_v6 = vmax.f32 %v578_v61, 0.0  ;;  %v3362_v52 = vpop.permute.xlu2 %1550 }
 0x182   : > { %v735_v10 = vmax.f32 %v667_v63, 0.0  ;;  %vm1619_vm13 = vcmp.eq.s32.totalorder %v3256_v26, %v3362_v52 }
 0x183   : > { %v3320_v58 = vadd.f32 %v1027_v56, %v939_v55 }
 0x185   : > { %1166 = vmax.xlane.f32.xlu2 %v3311_v43  ;;  %v1644_v62 = vsel %vm1612_vm6, %v3320_v58, 0.0 }
 0x186   : > { %v579_v0 = vpop.f32.mrf.mxu0  ;;  %1168 = vmax.xlane.f32.xlu0 %v3320_v58  ;;  %1682 = vadd.xlane.f32.xlu1 %v1644_v62 }
 0x187   : > { %v580_v1 = vadd.f32 %v579_v0, %v3184_v53  ;;  %v668_v2 = vpop.f32.mrf.mxu1  ;;  %v3371_v0 = vpop.permute.xlu1 %1562 }
 0x188   : > { %v669_v4 = vadd.f32 %v668_v2, %v3186_v54  ;;  %v940_v5 = vpop.f32.mrf.mxu2  ;;  %v3374_v2 = vpop.permute.xlu0 %1574  ;;  %vm1623_vm1 = vcmp.eq.s32.totalorder %v3256_v26, %v3371_v0 }
 0x189   : > { %v736_v7 = vmax.f32 %v580_v1, 0.0  ;;  %v941_v8 = vadd.f32 %v3254_v23, %v940_v5  ;;  %v1029_v9 = vpop.f32.mrf.mxu3  ;;  %vm1627_vm5 = vcmp.eq.s32.totalorder %v3256_v26, %v3374_v2 }
 0x18a   : > { %v737_v12 = vmax.f32 %v669_v4, 0.0 }
 0x18b   : > { %v774_v13 = vpack.c.bf16 %v736_v7, %v734_v6  ;;  %v3333_v14 = vadd.f32 %v1029_v9, %v941_v8  ;;  %v3381_v6 = vpop.permute.xlu2 %1559 }
 0x18c   : > { %v775_v15 = vpack.c.bf16 %v737_v12, %v735_v10  ;;  %vm1622_vm0 = vcmp.eq.s32.totalorder %v3256_v26, %v3381_v6 }
 0x18d   : > { %v2429_v17 = vpack.c.bf16 %v3333_v14, %v3320_v58  ;;  %982 = vmatmul.bf16.gmra.mxu2 %v774_v13  ;;  %v1645_v18 = vsel %vm1613_vm7, %v3333_v14, 0.0 }
 0x18e   : > { %1071 = vmatmul.bf16.gmra.mxu3 %v775_v15  ;;  %v582_v20 = vpop.f32.mrf.mxu0  ;;  %1684 = vadd.xlane.f32.xlu2 %v1645_v18 }
 0x18f   : > { %2493 = vst [vmem:[%s3275_s23 + $0x18] sm:$0xff] %v2429_v17   ;;  %v671_v21 = vpop.f32.mrf.mxu1  ;;  %1170 = vmax.xlane.f32.xlu1 %v3333_v14  ;;  %v583_v30 = vadd.f32 %v582_v20, %v3184_v53 }
 0x190   : > { %v943_v24 = vpop.f32.mrf.mxu2  ;;  %v672_v33 = vadd.f32 %v671_v21, %v3186_v54 }
 0x191   : > { %v944_v25 = vadd.f32 %v3254_v23, %v943_v24  ;;  %v1032_v27 = vpop.f32.mrf.mxu3  ;;  %v738_v42 = vmax.f32 %v583_v30, 0.0  ;;  %v3394_v30 = vpop.permute.xlu0 %1583 }
 0x192   : > { %v739_v48 = vmax.f32 %v672_v33, 0.0 }
 0x193   : > { %v3346_v29 = vadd.f32 %v1032_v27, %v944_v25  ;;  %v3388_v25 = vpop.permute.xlu1 %1571 }
 0x194   : > { %vm1626_vm4 = vcmp.eq.s32.totalorder %v3256_v26, %v3388_v25 }
 0x195   : > { %v1646_v32 = vsel %vm1614_vm8, %v3346_v29, 0.0  ;;  %vm1766_vm8 = vcmask 7168  }
 0x196   : > { %v584_v34 = vpop.f32.mrf.mxu0  ;;  %1172 = vmax.xlane.f32.xlu2 %v3346_v29  ;;  %1686 = vadd.xlane.f32.xlu0 %v1646_v32 }
 0x197   : > { %v585_v36 = vadd.f32 %v584_v34, %v3184_v53  ;;  %v673_v37 = vpop.f32.mrf.mxu1 }
 0x198   : > { %v674_v40 = vadd.f32 %v673_v37, %v3186_v54  ;;  %v945_v41 = vpop.f32.mrf.mxu2 }
 0x199   : > { %v740_v44 = vmax.f32 %v585_v36, 0.0  ;;  %v946_v45 = vadd.f32 %v3254_v23, %v945_v41  ;;  %v1034_v47 = vpop.f32.mrf.mxu3 }
 0x19a   : > { %v741_v49 = vmax.f32 %v674_v40, 0.0  ;;  %v3401_v40 = vpop.permute.xlu2 %1568 }
 0x19b   : > { %v776_v50 = vpack.c.bf16 %v740_v44, %v738_v42  ;;  %v3360_v51 = vadd.f32 %v1034_v47, %v946_v45  ;;  %v3408_v45 = vpop.permute.xlu1 %1580  ;;  %vm1625_vm3 = vcmp.eq.s32.totalorder %v3256_v26, %v3401_v40 }
 0x19c   : > { %v777_v55 = vpack.c.bf16 %v741_v49, %v739_v48  ;;  %v3412_v49 = vpop.permute.xlu0 %1592  ;;  %vm1629_vm7 = vcmp.eq.s32.totalorder %v3256_v26, %v3408_v45 }
 0x19d   : > { %v2434_v56 = vpack.c.bf16 %v3360_v51, %v3346_v29  ;;  %987 = vmatmul.bf16.gmra.mxu2 %v776_v50  ;;  %v1647_v57 = vsel %vm1615_vm9, %v3360_v51, 0.0  ;;  %vm1630_vm9 = vcmp.eq.s32.totalorder %v3256_v26, %v3394_v30 }
 0x19e   : > { %1076 = vmatmul.bf16.gmra.mxu3 %v777_v55  ;;  %v587_v61 = vpop.f32.mrf.mxu0  ;;  %1174 = vmax.xlane.f32.xlu0 %v3360_v51 }
 0x19f   : > { %2494 = vst [vmem:[%s3275_s23 + $0x20] sm:$0xff] %v2434_v56   ;;  %v676_v62 = vpop.f32.mrf.mxu1  ;;  %1688 = vadd.xlane.f32.xlu1 %v1647_v57  ;;  %v588_v4 = vadd.f32 %v587_v61, %v3184_v53 }
 0x1a0   : > { %v948_v63 = vpop.f32.mrf.mxu2  ;;  %v677_v7 = vadd.f32 %v676_v62, %v3186_v54 }
 0x1a1   : > { %v949_v1 = vadd.f32 %v3254_v23, %v948_v63  ;;  %v1037_v39 = vpop.f32.mrf.mxu3  ;;  %v742_v15 = vmax.f32 %v588_v4, 0.0 }
 0x1a2   : > { %v743_v21 = vmax.f32 %v677_v7, 0.0  ;;  %v3419_v4 = vpop.permute.xlu2 %1577 }
 0x1a3   : > { %v3376_v3 = vadd.f32 %v1037_v39, %v949_v1  ;;  %vm1628_vm6 = vcmp.eq.s32.totalorder %v3256_v26, %v3419_v4 }
 0x1a5   : > { %v1648_v5 = vsel %vm1616_vm10, %v3376_v3, 0.0 }
 0x1a6   : > { %v589_v8 = vpop.f32.mrf.mxu0  ;;  %1690 = vadd.xlane.f32.xlu2 %v1648_v5 }
 0x1a7   : > { %v590_v9 = vadd.f32 %v589_v8, %v3184_v53  ;;  %v678_v10 = vpop.f32.mrf.mxu1  ;;  %1176 = vmax.xlane.f32.xlu1 %v3376_v3 }
 0x1a8   : > { %v679_v12 = vadd.f32 %v678_v10, %v3186_v54  ;;  %v950_v13 = vpop.f32.mrf.mxu2 }
 0x1a9   : > { %v744_v17 = vmax.f32 %v590_v9, 0.0  ;;  %v951_v18 = vadd.f32 %v3254_v23, %v950_v13  ;;  %v1039_v20 = vpop.f32.mrf.mxu3  ;;  %v3432_v13 = vpop.permute.xlu0 %1601 }
 0x1aa   : > { %v745_v24 = vmax.f32 %v679_v12, 0.0  ;;  %v3428_v12 = vpop.permute.xlu1 %1589 }
 0x1ab   : > { %v778_v27 = vpack.c.bf16 %v744_v17, %v742_v15  ;;  %v3390_v28 = vadd.f32 %v1039_v20, %v951_v18  ;;  %4116 = vst [vmem:[#allocation6_spill] sm:$0xff] %v3428_v12  ;;  %v3439_v20 = vpop.permute.xlu2 %1586 }
 0x1ac   : > { %v779_v32 = vpack.c.bf16 %v745_v24, %v743_v21  ;;  %vm1631_vm10 = vcmp.eq.s32.totalorder %v3256_v26, %v3439_v20 }
 0x1ad   : > { %v2439_v33 = vpack.c.bf16 %v3390_v28, %v3376_v3  ;;  %992 = vmatmul.bf16.gmra.mxu2 %v778_v27  ;;  %v1649_v34 = vsel %vm1617_vm11, %v3390_v28, 0.0  ;;  %vm1633_vm11 = vcmp.eq.s32.totalorder %v3256_v26, %v3412_v49 }
 0x1ae   : > { %1081 = vmatmul.bf16.gmra.mxu3 %v779_v32  ;;  %v592_v36 = vpop.f32.mrf.mxu0  ;;  %1178 = vmax.xlane.f32.xlu2 %v3390_v28 }
 0x1af   : > { %2495 = vst [vmem:[%s3275_s23 + $0x28] sm:$0xff] %v2439_v33   ;;  %v681_v37 = vpop.f32.mrf.mxu1  ;;  %1692 = vadd.xlane.f32.xlu0 %v1649_v34  ;;  %v593_v47 = vadd.f32 %v592_v36, %v3184_v53 }
 0x1b0   : > { %v953_v41 = vpop.f32.mrf.mxu2  ;;  %v682_v50 = vadd.f32 %v681_v37, %v3186_v54 }
 0x1b1   : > { %v954_v16 = vadd.f32 %v3254_v23, %v953_v41  ;;  %v1042_v42 = vpop.f32.mrf.mxu3  ;;  %v746_v62 = vmax.f32 %v593_v47, 0.0 }
 0x1b2   : > { %v747_v5 = vmax.f32 %v682_v50, 0.0  ;;  %v3445_v32 = vpop.permute.xlu1 %1598 }
 0x1b3   : > { %v3404_v44 = vadd.f32 %v1042_v42, %v954_v16  ;;  %4117 = vst [vmem:[#allocation7_spill] sm:$0xff] %v3445_v32  ;;  %v3457_v42 = vpop.permute.xlu2 %1595 }
 0x1b5   : > { %v1650_v48 = vsel %vm1618_vm12, %v3404_v44, 0.0  ;;  %vm1634_vm12 = vcmp.eq.s32.totalorder %v3256_v26, %v3457_v42 }
 0x1b6   : > { %v594_v55 = vpop.f32.mrf.mxu0  ;;  %1694 = vadd.xlane.f32.xlu1 %v1650_v48 }
 0x1b7   : > { %v595_v56 = vadd.f32 %v594_v55, %v3184_v53  ;;  %v683_v57 = vpop.f32.mrf.mxu1  ;;  %1180 = vmax.xlane.f32.xlu0 %v3404_v44 }
 0x1b8   : > { %v684_v61 = vadd.f32 %v683_v57, %v3186_v54  ;;  %v955_v60 = vpop.f32.mrf.mxu2 }
 0x1b9   : > { %v748_v63 = vmax.f32 %v595_v56, 0.0  ;;  %v956_v1 = vadd.f32 %v3254_v23, %v955_v60  ;;  %v1044_v39 = vpop.f32.mrf.mxu3 }
 0x1ba   : > { %v749_v7 = vmax.f32 %v684_v61, 0.0 }
 0x1bb   : > { %v780_v8 = vpack.c.bf16 %v748_v63, %v746_v62  ;;  %v3421_v9 = vadd.f32 %v1044_v39, %v956_v1  ;;  %v3471_v60 = vpop.permute.xlu2 %1604 }
 0x1bc   : > { %v781_v53 = vpack.c.bf16 %v749_v7, %v747_v5  ;;  %4118 = vst [vmem:[#allocation8_spill] sm:$0xff] %v3471_v60 }
 0x1bd   : > { %v2444_v54 = vpack.c.bf16 %v3421_v9, %v3404_v44  ;;  %997 = vmatmul.bf16.gmra.mxu2 %v780_v8  ;;  %v1651_v10 = vsel %vm1619_vm13, %v3421_v9, 0.0  ;;  %vm1636_vm13 = vcmp.eq.s32.totalorder %v3256_v26, %v3432_v13 }
 0x1be   : > { %1086 = vmatmul.bf16.gmra.mxu3 %v781_v53  ;;  %1696 = vadd.xlane.f32.xlu2 %v1651_v10 }
 0x1bf   : > { %2496 = vst [vmem:[%s3275_s23 + $0x30] sm:$0xff] %v2444_v54   ;;  %1182 = vmax.xlane.f32.xlu1 %v3421_v9 }
 0x1c0   : > { %v958_v15 = vpop.f32.mrf.mxu2 }
 0x1c1   : > { %v959_v17 = vadd.f32 %v3254_v23, %v958_v15  ;;  %v1047_v52 = vpop.f32.mrf.mxu3 }
 0x1c3   : > { %v3435_v18 = vadd.f32 %v1047_v52, %v959_v17 }
 0x1c5   : > { %v1652_v21 = vsel %vm1620_vm14, %v3435_v18, 0.0 }
 0x1c6   : > { %1184 = vmax.xlane.f32.xlu2 %v3435_v18  ;;  %1698 = vadd.xlane.f32.xlu0 %v1652_v21 }
 0x1c8   : > { %v960_v24 = vpop.f32.mrf.mxu2  ;;  %v3443_v27 = vpop.xlane.xlu0 %1156 }
 0x1c9   : > { %v961_v33 = vadd.f32 %v3254_v23, %v960_v24  ;;  %v1049_v34 = vpop.f32.mrf.mxu3  ;;  %v1220_v36 = vsub.f32 %v3260_v31, %v3443_v27  ;;  %v3463_v48 = vpop.xlane.xlu1 %1670 }
 0x1cb   : > { %v3450_v35 = vadd.f32 %v1049_v34, %v961_v33  ;;  %v1252_v37 = vmul.f32 1.442695, %v1220_v36 }
 0x1cd   : > { %v2449_v41 = vpack.c.bf16 %v3450_v35, %v3435_v18  ;;  %2615 = vpow2.f32 %v1252_v37  ;;  %v1653_v16 = vsel %vm1621_vm15, %v3450_v35, 0.0 }
 0x1ce   : > { %1186 = vmax.xlane.f32.xlu0 %v3450_v35  ;;  %1700 = vadd.xlane.f32.xlu1 %v1653_v16 }
 0x1cf   : > { %2497 = vst [vmem:[%s3275_s23 + $0x38] sm:$0xff] %v2449_v41  }
 0x1d0   : > { %v963_v47 = vpop.f32.mrf.mxu2  ;;  %v3461_v31 = vpop.xlane.xlu0 %1158 }
 0x1d1   : > { %v964_v50 = vadd.f32 %v3254_v23, %v963_v47  ;;  %v1052_v19 = vpop.f32.mrf.mxu3  ;;  %v1221_v55 = vsub.f32 %v3270_v46, %v3461_v31 }
 0x1d3   : > { %v2616_v56 = vpop.eup %2615  ;;  %v3468_v57 = vadd.f32 %v1052_v19, %v964_v50  ;;  %v1254_v61 = vmul.f32 1.442695, %v1221_v55 }
 0x1d4   : > { %1316 = vadd.xlane.f32.xlu2 %v2616_v56 }
 0x1d5   : > { %2617 = vpow2.f32 %v1254_v61  ;;  %v1654_v8 = vsel %vm1622_vm0, %v3468_v57, 0.0 }
 0x1d6   : > { %1188 = vmax.xlane.f32.xlu1 %v3468_v57 }
 0x1d8   : > { %v965_v62 = vpop.f32.mrf.mxu2  ;;  %v3474_v39 = vpop.xlane.xlu1 %1160 }
 0x1d9   : > { %v966_v63 = vadd.f32 %v3254_v23, %v965_v62  ;;  %v1054_v1 = vpop.f32.mrf.mxu3  ;;  %v1222_v46 = vsub.f32 %v3281_v59, %v3474_v39  ;;  %v3486_v10 = vpop.xlane.xlu2 %1674 }
 0x1da   : > { %v3501_v0 = vpop.xlane.xlu0 %1672 }
 0x1db   : > { %v2618_v5 = vpop.eup %2617  ;;  %v3480_v7 = vadd.f32 %v1054_v1, %v966_v63  ;;  %v1256_v53 = vmul.f32 1.442695, %v1222_v46 }
 0x1dc   : > { %1702 = vadd.xlane.f32.xlu2 %v1654_v8  ;;  %1318 = vadd.xlane.f32.xlu0 %v2618_v5 }
 0x1dd   : > { %v2454_v54 = vpack.c.bf16 %v3480_v7, %v3468_v57  ;;  %2619 = vpow2.f32 %v1256_v53  ;;  %v1655_v52 = vsel %vm1623_vm1, %v3480_v7, 0.0 }
 0x1df   : > { %2498 = vst [vmem:[%s3275_s23 + $0x40] sm:$0xff] %v2454_v54  }
 0x1e0   : > { %v968_v15 = vpop.f32.mrf.mxu2  ;;  %v3488_v17 = vpop.xlane.xlu1 %1162 }
 0x1e1   : > { %v1057_v6 = vpop.f32.mrf.mxu3  ;;  %v1223_v59 = vsub.f32 %v3291_v11, %v3488_v17  ;;  %v969_v24 = vadd.f32 %v3254_v23, %v968_v15 }
 0x1e3   : > { %v2620_v21 = vpop.eup %2619  ;;  %v1258_v33 = vmul.f32 1.442695, %v1223_v59  ;;  %v3497_v34 = vadd.f32 %v1057_v6, %v969_v24 }
 0x1e4   : > { %1190 = vmax.xlane.f32.xlu2 %v3480_v7  ;;  %1704 = vadd.xlane.f32.xlu0 %v1655_v52 }
 0x1e5   : > { %1320 = vadd.xlane.f32.xlu1 %v2620_v21  ;;  %2621 = vpow2.f32 %v1258_v33  ;;  %v1656_v55 = vsel %vm1624_vm2, %v3497_v34, 0.0 }
 0x1e8   : > { %v970_v36 = vpop.f32.mrf.mxu2  ;;  %v3499_v37 = vpop.xlane.xlu2 %1164 }
 0x1e9   : > { %v971_v11 = vadd.f32 %v3254_v23, %v970_v36  ;;  %v1059_v41 = vpop.f32.mrf.mxu3  ;;  %v1224_v16 = vsub.f32 %v3299_v22, %v3499_v37  ;;  %v3519_v63 = vpop.xlane.xlu1 %1676 }
 0x1eb   : > { %v3508_v47 = vadd.f32 %v1059_v41, %v971_v11  ;;  %v1260_v50 = vmul.f32 1.442695, %v1224_v16  ;;  %v2622_v19 = vpop.eup %2621 }
 0x1ec   : > { %1192 = vmax.xlane.f32.xlu0 %v3497_v34  ;;  %1322 = vadd.xlane.f32.xlu2 %v2622_v19 }
 0x1ed   : > { %v2459_v56 = vpack.c.bf16 %v3508_v47, %v3497_v34  ;;  %2623 = vpow2.f32 %v1260_v50  ;;  %1706 = vadd.xlane.f32.xlu1 %v1656_v55  ;;  %v1657_v5 = vsel %vm1625_vm3, %v3508_v47, 0.0 }
 0x1ef   : > { %2499 = vst [vmem:[%s3275_s23 + $0x48] sm:$0xff] %v2459_v56  }
 0x1f0   : > { %v973_v61 = vpop.f32.mrf.mxu2  ;;  %v3515_v22 = vpop.xlane.xlu2 %1678 }
 0x1f1   : > { %v1062_v62 = vpop.f32.mrf.mxu3  ;;  %v3517_v38 = vpop.xlane.xlu0 %1680  ;;  %v974_v46 = vadd.f32 %v3254_v23, %v973_v61 }
 0x1f3   : > { %v2624_v1 = vpop.eup %2623  ;;  %v3526_v8 = vadd.f32 %v1062_v62, %v974_v46 }
 0x1f4   : > { %1324 = vadd.xlane.f32.xlu0 %v2624_v1  ;;  %1708 = vadd.xlane.f32.xlu2 %v1657_v5 }
 0x1f5   : > { %1194 = vmax.xlane.f32.xlu1 %v3508_v47  ;;  %v1658_v36 = vsel %vm1626_vm4, %v3526_v8, 0.0 }
 0x1f8   : > { %v975_v53 = vpop.f32.mrf.mxu2  ;;  %v3528_v54 = vpop.xlane.xlu2 %1166 }
 0x1f9   : > { %v976_v15 = vadd.f32 %v3254_v23, %v975_v53  ;;  %v1064_v6 = vpop.f32.mrf.mxu3  ;;  %v1225_v40 = vsub.f32 %v3311_v43, %v3528_v54  ;;  %v3533_v59 = vpop.xlane.xlu0 %1168 }
 0x1fa   : > { %v1226_v52 = vsub.f32 %v3320_v58, %v3533_v59  ;;  %v3539_v21 = vpop.xlane.xlu1 %1682 }
 0x1fb   : > { %v3541_v24 = vadd.f32 %v1064_v6, %v976_v15  ;;  %v1262_v33 = vmul.f32 1.442695, %v1225_v40 }
 0x1fc   : > { %v1264_v11 = vmul.f32 1.442695, %v1226_v52  ;;  %1710 = vadd.xlane.f32.xlu0 %v1658_v36  ;;  %1196 = vmax.xlane.f32.xlu2 %v3526_v8 }
 0x1fd   : > { %v2464_v43 = vpack.c.bf16 %v3541_v24, %v3526_v8  ;;  %2625 = vpow2.f32 %v1262_v33  ;;  %v1659_v6 = vsel %vm1627_vm5, %v3541_v24, 0.0 }
 0x1fe   : > { %2627 = vpow2.f32 %v1264_v11 }
 0x1ff   : > { %2500 = vst [vmem:[%s3275_s23 + $0x50] sm:$0xff] %v2464_v43  }
 0x200   : > { %v978_v25 = vpop.f32.mrf.mxu2 }
 0x201   : > { %v1067_v41 = vpop.f32.mrf.mxu3  ;;  %v3548_v58 = vpop.xlane.xlu2 %1684  ;;  %v979_v56 = vadd.f32 %v3254_v23, %v978_v25 }
 0x202   : > { %v3550_v16 = vpop.xlane.xlu1 %1170 }
 0x203   : > { %v2626_v50 = vpop.eup %2625  ;;  %v1227_v19 = vsub.f32 %v3333_v14, %v3550_v16  ;;  %v3556_v62 = vadd.f32 %v1067_v41, %v979_v56 }
 0x204   : > { %v2628_v55 = vpop.eup %2627  ;;  %1198 = vmax.xlane.f32.xlu0 %v3541_v24  ;;  %1326 = vadd.xlane.f32.xlu1 %v2626_v50 }
 0x205   : > { %v1266_v61 = vmul.f32 1.442695, %v1227_v19  ;;  %1328 = vadd.xlane.f32.xlu2 %v2628_v55  ;;  %v1660_v40 = vsel %vm1628_vm6, %v3556_v62, 0.0 }
 0x207   : > { %2629 = vpow2.f32 %v1266_v61 }
 0x208   : > { %v980_v1 = vpop.f32.mrf.mxu2 }
 0x209   : > { %v981_v46 = vadd.f32 %v3254_v23, %v980_v1  ;;  %v1069_v5 = vpop.f32.mrf.mxu3  ;;  %v3561_v14 = vpop.xlane.xlu2 %1172 }
 0x20a   : > { %v3563_v53 = vpop.xlane.xlu0 %1686  ;;  %v1228_v2 = vsub.f32 %v3346_v29, %v3561_v14 }
 0x20b   : > { %v3567_v15 = vadd.f32 %v1069_v5, %v981_v46 }
 0x20c   : > { %1712 = vadd.xlane.f32.xlu1 %v1659_v6  ;;  %v1268_v11 = vmul.f32 1.442695, %v1228_v2 }
 0x20d   : > { %v2630_v52 = vpop.eup %2629  ;;  %v2469_v33 = vpack.c.bf16 %v3567_v15, %v3556_v62  ;;  %1714 = vadd.xlane.f32.xlu2 %v1660_v40  ;;  %v1661_v50 = vsel %vm1629_vm7, %v3567_v15, 0.0 }
 0x20e   : > { %1330 = vadd.xlane.f32.xlu0 %v2630_v52  ;;  %2631 = vpow2.f32 %v1268_v11 }
 0x20f   : > { %2501 = vst [vmem:[%s3275_s23 + $0x58] sm:$0xff] %v2469_v33  }
 0x210   : > { %v983_v36 = vpop.f32.mrf.mxu2 }
 0x211   : > { %v1072_v4 = vpop.f32.mrf.mxu3  ;;  %v984_v19 = vadd.f32 %v3254_v23, %v983_v36 }
 0x212   : > { %v3576_v43 = vpop.xlane.xlu0 %1174  ;;  %v3578_v25 = vpop.xlane.xlu1 %1688 }
 0x213   : > { %v1229_v41 = vsub.f32 %v3360_v51, %v3576_v43  ;;  %v3593_v46 = vadd.f32 %v1072_v4, %v984_v19 }
 0x214   : > { %1200 = vmax.xlane.f32.xlu1 %v3556_v62  ;;  %v2632_v1 = vpop.eup %2631 }
 0x215   : > { %v1270_v29 = vmul.f32 1.442695, %v1229_v41  ;;  %1202 = vmax.xlane.f32.xlu2 %v3567_v15 }
 0x216   : > { %1716 = vadd.xlane.f32.xlu0 %v1661_v50 }
 0x217   : > { %2633 = vpow2.f32 %v1270_v29 }
 0x218   : > { %v985_v55 = vpop.f32.mrf.mxu2 }
 0x219   : > { %v986_v56 = vadd.f32 %v3254_v23, %v985_v55  ;;  %v1074_v51 = vpop.f32.mrf.mxu3  ;;  %v3589_v61 = vpop.xlane.xlu2 %1690 }
 0x21a   : > { %v3591_v45 = vpop.xlane.xlu1 %1176 }
 0x21b   : > { %v3595_v5 = vadd.f32 %v1074_v51, %v986_v56  ;;  %v1230_v6 = vsub.f32 %v3376_v3, %v3591_v45 }
 0x21c   : > { %1332 = vadd.xlane.f32.xlu1 %v2632_v1 }
 0x21d   : > { %v2634_v40 = vpop.eup %2633  ;;  %v2474_v52 = vpack.c.bf16 %v3595_v5, %v3593_v46  ;;  %v1272_v33 = vmul.f32 1.442695, %v1230_v6 }
 0x21e   : > { %1334 = vadd.xlane.f32.xlu2 %v2634_v40  ;;  %1204 = vmax.xlane.f32.xlu0 %v3593_v46 }
 0x21f   : > { %2502 = vst [vmem:[%s3275_s23 + $0x60] sm:$0xff] %v2474_v52   ;;  %2635 = vpow2.f32 %v1272_v33 }
 0x220   : > { %v988_v2 = vpop.f32.mrf.mxu2 }
 0x221   : > { %v989_v36 = vadd.f32 %v3254_v23, %v988_v2  ;;  %v1077_v11 = vpop.f32.mrf.mxu3  ;;  %v3604_v4 = vpop.xlane.xlu2 %1178 }
 0x222   : > { %v1231_v3 = vsub.f32 %v3390_v28, %v3604_v4  ;;  %v3608_v41 = vpop.xlane.xlu0 %1692 }
 0x223   : > { %v3610_v29 = vadd.f32 %v1077_v11, %v989_v36 }
 0x224   : > { %v1274_v50 = vmul.f32 1.442695, %v1231_v3  ;;  %1206 = vmax.xlane.f32.xlu1 %v3595_v5 }
 0x225   : > { %v2636_v19 = vpop.eup %2635 }
 0x226   : > { %2637 = vpow2.f32 %v1274_v50  ;;  %1208 = vmax.xlane.f32.xlu2 %v3610_v29  ;;  %1336 = vadd.xlane.f32.xlu0 %v2636_v19 }
 0x228   : > { %v990_v55 = vpop.f32.mrf.mxu2 }
 0x229   : > { %v991_v56 = vadd.f32 %v3254_v23, %v990_v55  ;;  %v1079_v51 = vpop.f32.mrf.mxu3  ;;  %v3615_v1 = vpop.xlane.xlu1 %1694 }
 0x22a   : > { %v3617_v28 = vpop.xlane.xlu0 %1180 }
 0x22b   : > { %v3619_v6 = vadd.f32 %v1079_v51, %v991_v56  ;;  %v1232_v40 = vsub.f32 %v3404_v44, %v3617_v28 }
 0x22c   : > { %v2638_v52 = vpop.eup %2637 }
 0x22d   : > { %v2479_v33 = vpack.c.bf16 %v3619_v6, %v3610_v29  ;;  %v1276_v2 = vmul.f32 1.442695, %v1232_v40  ;;  %1338 = vadd.xlane.f32.xlu1 %v2638_v52 }
 0x22e   : > { %1210 = vmax.xlane.f32.xlu0 %v3619_v6 }
 0x22f   : > { %2503 = vst [vmem:[%s3275_s23 + $0x68] sm:$0xff] %v2479_v33   ;;  %2639 = vpow2.f32 %v1276_v2 }
 0x230   : > { %v993_v36 = vpop.f32.mrf.mxu2 }
 0x231   : > { %v994_v11 = vadd.f32 %v3254_v23, %v993_v36  ;;  %v1082_v3 = vpop.f32.mrf.mxu3  ;;  %v3628_v50 = vpop.xlane.xlu2 %1696 }
 0x232   : > { %v3630_v19 = vpop.xlane.xlu1 %1182 }
 0x233   : > { %v3632_v55 = vadd.f32 %v1082_v3, %v994_v11  ;;  %v1233_v44 = vsub.f32 %v3421_v9, %v3630_v19 }
 0x235   : > { %v2640_v56 = vpop.eup %2639  ;;  %v1278_v51 = vmul.f32 1.442695, %v1233_v44  ;;  %1212 = vmax.xlane.f32.xlu1 %v3632_v55 }
 0x236   : > { %1340 = vadd.xlane.f32.xlu2 %v2640_v56 }
 0x237   : > { %2641 = vpow2.f32 %v1278_v51 }
 0x238   : > { %v995_v40 = vpop.f32.mrf.mxu2 }
 0x239   : > { %v996_v52 = vadd.f32 %v3254_v23, %v995_v40  ;;  %v1084_v33 = vpop.f32.mrf.mxu3  ;;  %v3638_v2 = vpop.xlane.xlu2 %1184 }
 0x23a   : > { %v1234_v36 = vsub.f32 %v3435_v18, %v3638_v2  ;;  %v3642_v11 = vpop.xlane.xlu0 %1698 }
 0x23b   : > { %v3644_v3 = vadd.f32 %v1084_v33, %v996_v52 }
 0x23c   : > { %v1280_v9 = vmul.f32 1.442695, %v1234_v36 }
 0x23d   : > { %v2642_v44 = vpop.eup %2641  ;;  %v2484_v32 = vpack.c.bf16 %v3644_v3, %v3632_v55 }
 0x23e   : > { %2643 = vpow2.f32 %v1280_v9  ;;  %1214 = vmax.xlane.f32.xlu2 %v3644_v3  ;;  %1342 = vadd.xlane.f32.xlu0 %v2642_v44  ;;  %v2743_v9 = vld [vmem:[%s4115_s4] ss:$0 sm:$0xff] }
 0x23f   : > { %2504 = vst [vmem:[%s3275_s23 + $0x70] sm:$0xff] %v2484_v32  }
 0x240   : > { %v998_v56 = vpop.f32.mrf.mxu2 }
 0x241   : > { %v999_v51 = vadd.f32 %v3254_v23, %v998_v56  ;;  %v1087_v40 = vpop.f32.mrf.mxu3  ;;  %v3651_v60 = vpop.xlane.xlu1 %1700 }
 0x242   : > { %4119 = vst [vmem:[#allocation9_spill] sm:$0xff] %v3651_v60  ;;  %v3653_v18 = vpop.xlane.xlu0 %1186 }
 0x243   : > { %v3655_v52 = vadd.f32 %v1087_v40, %v999_v51  ;;  %v1235_v33 = vsub.f32 %v3450_v35, %v3653_v18 }
 0x244   : > { %v2644_v36 = vpop.eup %2643 }
 0x245   : > { %v1282_v12 = vmul.f32 1.442695, %v1235_v33  ;;  %1344 = vadd.xlane.f32.xlu1 %v2644_v36 }
 0x246   : > { %1216 = vmax.xlane.f32.xlu0 %v3655_v52 }
 0x247   : > { %2645 = vpow2.f32 %v1282_v12  ;;  %v1317_v32 = vpop.xlane.xlu2 %1316 }
 0x248   : > { %2647 = vlog2.f32 %v1317_v32  ;;  %v1000_v23 = vpop.f32.mrf.mxu2 }
 0x249   : > { %v1001_v44 = vadd.f32 %v2743_v9, %v1000_v23  ;;  %v3663_v56 = vpop.xlane.xlu1 %1188  ;;  %v1089_v51 = vpop.f32.mrf.mxu3 }
 0x24a   : > { %v1236_v35 = vsub.f32 %v3468_v57, %v3663_v56 }
 0x24b   : > { %v3667_v40 = vadd.f32 %v1089_v51, %v1001_v44 }
 0x24c   : > { %v1284_v33 = vmul.f32 1.442695, %v1236_v35  ;;  %v1662_v35 = vsel %vm1630_vm9, %v3593_v46, 0.0 }
 0x24d   : > { %v2646_v12 = vpop.eup %2645  ;;  %v2489_v36 = vpack.c.bf16 %v3667_v40, %v3655_v52  ;;  %1218 = vmax.xlane.f32.xlu1 %v3667_v40 }
 0x24e   : > { %v2648_v32 = vpop.eup %2647  ;;  %2649 = vpow2.f32 %v1284_v33  ;;  %1346 = vadd.xlane.f32.xlu2 %v2646_v12 }
 0x24f   : > { %v1381_v23 = vmul.f32 0.6931472, %v2648_v32  ;;  %2505 = vst [vmem:[%s3275_s23 + $0x78] sm:$0xff] %v2489_v36   ;;  %v3674_v9 = vpop.xlane.xlu2 %1702  ;;  %v1319_v60 = vpop.xlane.xlu0 %1318 }
 0x250   : > { %2651 = vlog2.f32 %v1319_v60 }
 0x251   : > { %v1444_v57 = vadd.f32 %v1381_v23, %v3443_v27  ;;  %v1663_v27 = vsel %vm1631_vm10, %v3595_v5, 0.0 }
 0x253   : > { %v1734_v44 = vsub.f32 %v1444_v57, %v3463_v48 }
 0x254   : > { %v2650_v51 = vpop.eup %2649 }
 0x255   : > { %1767 = vst.msk [vmem:[%s3683_s14] sm:$0xff] %vm1766_vm8, %v1734_v44  ;;  %1718 = vadd.xlane.f32.xlu1 %v1662_v35  ;;  %1348 = vadd.xlane.f32.xlu0 %v2650_v51 }
 0x256   : > { %v2652_v60 = vpop.eup %2651  ;;  %1720 = vadd.xlane.f32.xlu2 %v1663_v27 }
 0x257   : > { %v1383_v30 = vmul.f32 0.6931472, %v2652_v60  ;;  %v3688_v48 = vpop.xlane.xlu2 %1190  ;;  %v3690_v33 = vpop.xlane.xlu0 %1704 }
 0x258   : > { %v1237_v20 = vsub.f32 %v3480_v7, %v3688_v48  ;;  %v1321_v12 = vpop.xlane.xlu1 %1320 }
 0x259   : > { %v1445_v36 = vadd.f32 %v1383_v30, %v3461_v31  ;;  %2653 = vlog2.f32 %v1321_v12 }
 0x25a   : > { %v1286_v32 = vmul.f32 1.442695, %v1237_v20 }
 0x25b   : > { %v1735_v23 = vsub.f32 %v1445_v36, %v3501_v0 }
 0x25c   : > { %2655 = vpow2.f32 %v1286_v32 }
 0x25d   : > { %1768 = vst.msk [vmem:[%s3683_s14 + $0x8] sm:$0xff] %vm1766_vm8, %v1735_v23 }
 0x25f   : > { %v2654_v57 = vpop.eup %2653  ;;  %v3698_v44 = vpop.xlane.xlu0 %1192 }
 0x260   : > { %v1385_v51 = vmul.f32 0.6931472, %v2654_v57  ;;  %v1238_v35 = vsub.f32 %v3497_v34, %v3698_v44  ;;  %v1323_v27 = vpop.xlane.xlu2 %1322  ;;  %v3702_v7 = vpop.xlane.xlu1 %1706 }
 0x261   : > { %2657 = vlog2.f32 %v1323_v27 }
 0x262   : > { %v2656_v31 = vpop.eup %2655  ;;  %v1446_v60 = vadd.f32 %v1385_v51, %v3474_v39  ;;  %v1288_v30 = vmul.f32 1.442695, %v1238_v35 }
 0x263   : > { %1350 = vadd.xlane.f32.xlu1 %v2656_v31 }
 0x264   : > { %v1736_v0 = vsub.f32 %v1446_v60, %v3486_v10  ;;  %2659 = vpow2.f32 %v1288_v30 }
 0x266   : > { %1769 = vst.msk [vmem:[%s3683_s14 + $0x10] sm:$0xff] %vm1766_vm8, %v1736_v0 }
 0x267   : > { %v2658_v20 = vpop.eup %2657  ;;  %v1325_v12 = vpop.xlane.xlu0 %1324 }
 0x268   : > { %v1387_v36 = vmul.f32 0.6931472, %v2658_v20  ;;  %2661 = vlog2.f32 %v1325_v12  ;;  %v3708_v34 = vpop.xlane.xlu2 %1708  ;;  %v3710_v32 = vpop.xlane.xlu1 %1194 }
 0x269   : > { %v1239_v23 = vsub.f32 %v3508_v47, %v3710_v32 }
 0x26a   : > { %v2660_v39 = vpop.eup %2659  ;;  %v1447_v57 = vadd.f32 %v1387_v36, %v3488_v17 }
 0x26b   : > { %v1290_v10 = vmul.f32 1.442695, %v1239_v23  ;;  %1352 = vadd.xlane.f32.xlu2 %v2660_v39 }
 0x26c   : > { %v1737_v51 = vsub.f32 %v1447_v57, %v3519_v63 }
 0x26d   : > { %2663 = vpow2.f32 %v1290_v10 }
 0x26e   : > { %v2662_v35 = vpop.eup %2661  ;;  %1770 = vst.msk [vmem:[%s3683_s14 + $0x18] sm:$0xff] %vm1766_vm8, %v1737_v51 }
 0x26f   : > { %v1389_v27 = vmul.f32 0.6931472, %v2662_v35  ;;  %v3718_v31 = vpop.xlane.xlu0 %1710 }
 0x270   : > { %v3720_v60 = vpop.xlane.xlu2 %1196 }
 0x271   : > { %v1448_v30 = vadd.f32 %v1389_v27, %v3499_v37  ;;  %v1240_v47 = vsub.f32 %v3526_v8, %v3720_v60 }
 0x273   : > { %v2664_v17 = vpop.eup %2663  ;;  %v1738_v0 = vsub.f32 %v1448_v30, %v3515_v22  ;;  %v1292_v20 = vmul.f32 1.442695, %v1240_v47 }
 0x274   : > { %1354 = vadd.xlane.f32.xlu0 %v2664_v17 }
 0x275   : > { %1771 = vst.msk [vmem:[%s3683_s14 + $0x20] sm:$0xff] %vm1766_vm8, %v1738_v0  ;;  %2665 = vpow2.f32 %v1292_v20 }
 0x277   : > { %v3728_v63 = vpop.xlane.xlu0 %1198  ;;  %v1327_v12 = vpop.xlane.xlu1 %1326 }
 0x278   : > { %v1241_v36 = vsub.f32 %v3541_v24, %v3728_v63  ;;  %2667 = vlog2.f32 %v1327_v12  ;;  %v1329_v23 = vpop.xlane.xlu2 %1328 }
 0x279   : > { %2669 = vlog2.f32 %v1329_v23 }
 0x27a   : > { %v1294_v37 = vmul.f32 1.442695, %v1241_v36 }
 0x27b   : > { %v2666_v39 = vpop.eup %2665 }
 0x27c   : > { %2671 = vpow2.f32 %v1294_v37  ;;  %1356 = vadd.xlane.f32.xlu1 %v2666_v39 }
 0x27e   : > { %v2668_v22 = vpop.eup %2667 }
 0x27f   : > { %v2670_v8 = vpop.eup %2669  ;;  %v1391_v57 = vmul.f32 0.6931472, %v2668_v22  ;;  %v3732_v10 = vpop.xlane.xlu1 %1712 }
 0x280   : > { %v1393_v51 = vmul.f32 0.6931472, %v2670_v8  ;;  %v3734_v35 = vpop.xlane.xlu2 %1714 }
 0x281   : > { %v1449_v27 = vadd.f32 %v1391_v57, %v3528_v54  ;;  %v1331_v24 = vpop.xlane.xlu0 %1330 }
 0x282   : > { %v2672_v30 = vpop.eup %2671  ;;  %v1450_v47 = vadd.f32 %v1393_v51, %v3533_v59  ;;  %2673 = vlog2.f32 %v1331_v24 }
 0x283   : > { %v1739_v17 = vsub.f32 %v1449_v27, %v3517_v38  ;;  %1358 = vadd.xlane.f32.xlu2 %v2672_v30 }
 0x284   : > { %v1740_v0 = vsub.f32 %v1450_v47, %v3539_v21 }
 0x285   : > { %1772 = vst.msk [vmem:[%s3683_s14 + $0x28] sm:$0xff] %vm1766_vm8, %v1739_v17 }
 0x286   : > { %1773 = vst.msk [vmem:[%s3683_s14 + $0x30] sm:$0xff] %vm1766_vm8, %v1740_v0 }
 0x287   : > { %v3744_v20 = vpop.xlane.xlu1 %1200 }
 0x288   : > { %v2674_v12 = vpop.eup %2673  ;;  %v1242_v54 = vsub.f32 %v3556_v62, %v3744_v20  ;;  %v3748_v36 = vpop.xlane.xlu2 %1202 }
 0x289   : > { %v1395_v59 = vmul.f32 0.6931472, %v2674_v12  ;;  %v1243_v38 = vsub.f32 %v3567_v15, %v3748_v36  ;;  %v3752_v23 = vpop.xlane.xlu0 %1716 }
 0x28a   : > { %v1296_v21 = vmul.f32 1.442695, %v1242_v54 }
 0x28b   : > { %v1451_v37 = vadd.f32 %v1395_v59, %v3550_v16  ;;  %v1298_v39 = vmul.f32 1.442695, %v1243_v38 }
 0x28c   : > { %2675 = vpow2.f32 %v1296_v21 }
 0x28d   : > { %v1741_v22 = vsub.f32 %v1451_v37, %v3548_v58  ;;  %2677 = vpow2.f32 %v1298_v39 }
 0x28f   : > { %1774 = vst.msk [vmem:[%s3683_s14 + $0x38] sm:$0xff] %vm1766_vm8, %v1741_v22  ;;  %v1333_v8 = vpop.xlane.xlu1 %1332 }
 0x290   : > { %2679 = vlog2.f32 %v1333_v8 }
 0x291   : > { %v1335_v62 = vpop.xlane.xlu2 %1334  ;;  %v3758_v57 = vpop.xlane.xlu0 %1204 }
 0x292   : > { %v2676_v51 = vpop.eup %2675  ;;  %2681 = vlog2.f32 %v1335_v62  ;;  %v1244_v15 = vsub.f32 %v3593_v46, %v3758_v57 }
 0x293   : > { %v2678_v27 = vpop.eup %2677  ;;  %1360 = vadd.xlane.f32.xlu0 %v2676_v51 }
 0x294   : > { %v1300_v16 = vmul.f32 1.442695, %v1244_v15  ;;  %1362 = vadd.xlane.f32.xlu1 %v2678_v27 }
 0x296   : > { %v2680_v24 = vpop.eup %2679  ;;  %2683 = vpow2.f32 %v1300_v16 }
 0x297   : > { %v1397_v58 = vmul.f32 0.6931472, %v2680_v24  ;;  %v3762_v30 = vpop.xlane.xlu1 %1206 }
 0x298   : > { %v2682_v47 = vpop.eup %2681  ;;  %v1245_v17 = vsub.f32 %v3595_v5, %v3762_v30 }
 0x299   : > { %v1452_v0 = vadd.f32 %v1397_v58, %v3561_v14  ;;  %v1399_v12 = vmul.f32 0.6931472, %v2682_v47  ;;  %v3767_v54 = vpop.xlane.xlu2 %1208  ;;  %v1337_v46 = vpop.xlane.xlu0 %1336 }
 0x29a   : > { %v1302_v59 = vmul.f32 1.442695, %v1245_v17  ;;  %v1246_v38 = vsub.f32 %v3610_v29, %v3767_v54  ;;  %2685 = vlog2.f32 %v1337_v46 }
 0x29b   : > { %v1742_v21 = vsub.f32 %v1452_v0, %v3563_v53  ;;  %v1453_v37 = vadd.f32 %v1399_v12, %v3576_v43 }
 0x29c   : > { %v2684_v39 = vpop.eup %2683  ;;  %2687 = vpow2.f32 %v1302_v59  ;;  %v1304_v22 = vmul.f32 1.442695, %v1246_v38 }
 0x29d   : > { %1775 = vst.msk [vmem:[%s3683_s14 + $0x40] sm:$0xff] %vm1766_vm8, %v1742_v21  ;;  %v1743_v14 = vsub.f32 %v1453_v37, %v3578_v25  ;;  %1364 = vadd.xlane.f32.xlu2 %v2684_v39 }
 0x29e   : > { %2689 = vpow2.f32 %v1304_v22 }
 0x29f   : > { %1776 = vst.msk [vmem:[%s3683_s14 + $0x48] sm:$0xff] %vm1766_vm8, %v1743_v14 }
 0x2a0   : > { %v2686_v5 = vpop.eup %2685  ;;  %v1339_v8 = vpop.xlane.xlu1 %1338 }
 0x2a1   : > { %v1401_v62 = vmul.f32 0.6931472, %v2686_v5  ;;  %v3778_v51 = vpop.xlane.xlu0 %1210  ;;  %2691 = vlog2.f32 %v1339_v8 }
 0x2a2   : > { %v2688_v53 = vpop.eup %2687  ;;  %v1247_v43 = vsub.f32 %v3619_v6, %v3778_v51 }
 0x2a3   : > { %v1454_v15 = vadd.f32 %v1401_v62, %v3591_v45  ;;  %1366 = vadd.xlane.f32.xlu0 %v2688_v53 }
 0x2a4   : > { %v2690_v27 = vpop.eup %2689  ;;  %v1306_v25 = vmul.f32 1.442695, %v1247_v43 }
 0x2a5   : > { %v1744_v16 = vsub.f32 %v1454_v15, %v3589_v61  ;;  %1368 = vadd.xlane.f32.xlu1 %v2690_v27 }
 0x2a6   : > { %2693 = vpow2.f32 %v1306_v25 }
 0x2a7   : > { %v2692_v24 = vpop.eup %2691  ;;  %1777 = vst.msk [vmem:[%s3683_s14 + $0x50] sm:$0xff] %vm1766_vm8, %v1744_v16 }
 0x2a8   : > { %v1403_v58 = vmul.f32 0.6931472, %v2692_v24  ;;  %v3786_v47 = vpop.xlane.xlu1 %1212 }
 0x2a9   : > { %v1341_v17 = vpop.xlane.xlu2 %1340  ;;  %v1248_v0 = vsub.f32 %v3632_v55, %v3786_v47 }
 0x2aa   : > { %v1455_v45 = vadd.f32 %v1403_v58, %v3604_v4  ;;  %2695 = vlog2.f32 %v1341_v17 }
 0x2ab   : > { %v1308_v12 = vmul.f32 1.442695, %v1248_v0 }
 0x2ac   : > { %v2694_v46 = vpop.eup %2693  ;;  %v1745_v61 = vsub.f32 %v1455_v45, %v3608_v41 }
 0x2ad   : > { %2697 = vpow2.f32 %v1308_v12  ;;  %1370 = vadd.xlane.f32.xlu2 %v2694_v46  ;;  %v1665_v12 = vsel %vm1633_vm11, %v3619_v6, 0.0  ;;  %v1668_v6 = vsel %vm1636_vm13, %v3655_v52, 0.0 }
 0x2ae   : > { %1778 = vst.msk [vmem:[%s3683_s14 + $0x58] sm:$0xff] %vm1766_vm8, %v1745_v61 }
 0x2b0   : > { %v2696_v59 = vpop.eup %2695 }
 0x2b1   : > { %v1405_v38 = vmul.f32 0.6931472, %v2696_v59  ;;  %v3794_v21 = vpop.xlane.xlu2 %1214  ;;  %v1343_v37 = vpop.xlane.xlu0 %1342 }
 0x2b2   : > { %v1249_v39 = vsub.f32 %v3644_v3, %v3794_v21  ;;  %2699 = vlog2.f32 %v1343_v37 }
 0x2b3   : > { %v2698_v4 = vpop.eup %2697  ;;  %v1456_v22 = vadd.f32 %v1405_v38, %v3617_v28  ;;  %v4120_v38 = vld [vmem:[#allocation9_spill] sm:$0xff] }
 0x2b4   : > { %v1310_v14 = vmul.f32 1.442695, %v1249_v39  ;;  %1372 = vadd.xlane.f32.xlu0 %v2698_v4 }
 0x2b5   : > { %v1746_v41 = vsub.f32 %v1456_v22, %v3615_v1  ;;  %v4121_v22 = vld [vmem:[#allocation6_spill] sm:$0xff] }
 0x2b6   : > { %2701 = vpow2.f32 %v1310_v14  ;;  %vm1632_vm14 = vcmp.eq.s32.totalorder %v3256_v26, %v4121_v22 }
 0x2b7   : > { %1779 = vst.msk [vmem:[%s3683_s14 + $0x60] sm:$0xff] %vm1766_vm8, %v1746_v41 }
 0x2b8   : > { %v2700_v5 = vpop.eup %2699  ;;  %v1345_v8 = vpop.xlane.xlu1 %1344 }
 0x2b9   : > { %v1407_v62 = vmul.f32 0.6931472, %v2700_v5  ;;  %v3802_v53 = vpop.xlane.xlu0 %1216  ;;  %2703 = vlog2.f32 %v1345_v8  ;;  %v4123_v8 = vld [vmem:[#allocation7_spill] sm:$0xff] }
 0x2ba   : > { %v1250_v43 = vsub.f32 %v3655_v52, %v3802_v53  ;;  %vm1635_vm0 = vcmp.eq.s32.totalorder %v3256_v26, %v4123_v8 }
 0x2bb   : > { %v1457_v15 = vadd.f32 %v1407_v62, %v3630_v19 }
 0x2bc   : > { %v2702_v28 = vpop.eup %2701  ;;  %v1312_v27 = vmul.f32 1.442695, %v1250_v43 }
 0x2bd   : > { %v1747_v25 = vsub.f32 %v1457_v15, %v3628_v50  ;;  %1374 = vadd.xlane.f32.xlu1 %v2702_v28 }
 0x2be   : > { %2705 = vpow2.f32 %v1312_v27 }
 0x2bf   : > { %v2704_v1 = vpop.eup %2703  ;;  %1780 = vst.msk [vmem:[%s3683_s14 + $0x68] sm:$0xff] %vm1766_vm8, %v1747_v25 }
 0x2c0   : > { %v1409_v16 = vmul.f32 0.6931472, %v2704_v1  ;;  %v3810_v24 = vpop.xlane.xlu1 %1218 }
 0x2c1   : > { %v1347_v58 = vpop.xlane.xlu2 %1346  ;;  %v1251_v17 = vsub.f32 %v3667_v40, %v3810_v24 }
 0x2c2   : > { %v1458_v0 = vadd.f32 %v1409_v16, %v3638_v2  ;;  %2707 = vlog2.f32 %v1347_v58 }
 0x2c3   : > { %v1314_v50 = vmul.f32 1.442695, %v1251_v17 }
 0x2c4   : > { %v2706_v19 = vpop.eup %2705  ;;  %v1748_v45 = vsub.f32 %v1458_v0, %v3642_v11  ;;  %v1666_v11 = vsel %vm1634_vm12, %v3632_v55, 0.0  ;;  %v1664_v55 = vsel %vm1632_vm14, %v3610_v29, 0.0 }
 0x2c5   : > { %2709 = vpow2.f32 %v1314_v50  ;;  %1724 = vadd.xlane.f32.xlu1 %v1665_v12  ;;  %1376 = vadd.xlane.f32.xlu2 %v2706_v19 }
 0x2c6   : > { %1781 = vst.msk [vmem:[%s3683_s14 + $0x70] sm:$0xff] %vm1766_vm8, %v1748_v45 }
 0x2c8   : > { %v2708_v46 = vpop.eup %2707  ;;  %v1349_v61 = vpop.xlane.xlu0 %1348 }
 0x2c9   : > { %v1411_v59 = vmul.f32 0.6931472, %v2708_v46  ;;  %2711 = vlog2.f32 %v1349_v61  ;;  %v3829_v39 = vpop.xlane.xlu1 %1718  ;;  %v3841_v41 = vpop.xlane.xlu2 %1720 }
 0x2cb   : > { %v2710_v2 = vpop.eup %2709  ;;  %v1459_v49 = vadd.f32 %v1411_v59, %v3653_v18  ;;  %v4122_v18 = vld [vmem:[#allocation8_spill] sm:$0xff] }
 0x2cc   : > { %1378 = vadd.xlane.f32.xlu0 %v2710_v2  ;;  %vm1637_vm15 = vcmp.eq.s32.totalorder %v3256_v26, %v4122_v18 }
 0x2cd   : > { %v1749_v37 = vsub.f32 %v1459_v49, %v4120_v38  ;;  %1730 = vadd.xlane.f32.xlu1 %v1668_v6  ;;  %1726 = vadd.xlane.f32.xlu2 %v1666_v11  ;;  %v1669_v14 = vsel %vm1637_vm15, %v3667_v40, 0.0 }
 0x2cf   : > { %v2712_v4 = vpop.eup %2711  ;;  %1782 = vst.msk [vmem:[%s3683_s14 + $0x78] sm:$0xff] %vm1766_vm8, %v1749_v37 }
 0x2d0   : > { %v1413_v42 = vmul.f32 0.6931472, %v2712_v4 }
 0x2d2   : > { %v1460_v13 = vadd.f32 %v1413_v42, %v3663_v56  ;;  %v1667_v56 = vsel %vm1635_vm0, %v3644_v3, 0.0 }
 0x2d4   : > { %v1750_v52 = vsub.f32 %v1460_v13, %v3674_v9  ;;  %1722 = vadd.xlane.f32.xlu0 %v1664_v55 }
 0x2d5   : > { %1732 = vadd.xlane.f32.xlu2 %v1669_v14 }
 0x2d6   : > { %1783 = vst.msk [vmem:[%s3683_s14 + $0x80] sm:$0xff] %vm1766_vm8, %v1750_v52  ;;  %v1351_v5 = vpop.xlane.xlu1 %1350 }
 0x2d7   : > { %2713 = vlog2.f32 %v1351_v5 }
 0x2dc   : > { %1728 = vadd.xlane.f32.xlu0 %v1667_v56 }
 0x2dd   : > { %v2714_v29 = vpop.eup %2713 }
 0x2de   : > { %v1415_v9 = vmul.f32 0.6931472, %v2714_v29  ;;  %v1353_v62 = vpop.xlane.xlu2 %1352 }
 0x2df   : > { %2715 = vlog2.f32 %v1353_v62 }
 0x2e0   : > { %v1461_v40 = vadd.f32 %v1415_v9, %v3688_v48 }
 0x2e2   : > { %v1751_v43 = vsub.f32 %v1461_v40, %v3690_v33 }
 0x2e4   : > { %1784 = vst.msk [vmem:[%s3683_s14 + $0x88] sm:$0xff] %vm1766_vm8, %v1751_v43 }
 0x2e5   : > { %v2716_v15 = vpop.eup %2715 }
 0x2e6   : > { %v1417_v28 = vmul.f32 0.6931472, %v2716_v15 }
 0x2e7   : > { %v1355_v27 = vpop.xlane.xlu0 %1354 }
 0x2e8   : > { %v1462_v26 = vadd.f32 %v1417_v28, %v3698_v44  ;;  %2717 = vlog2.f32 %v1355_v27 }
 0x2ea   : > { %v1752_v3 = vsub.f32 %v1462_v26, %v3702_v7 }
 0x2ec   : > { %1785 = vst.msk [vmem:[%s3683_s14 + $0x90] sm:$0xff] %vm1766_vm8, %v1752_v3 }
 0x2ee   : > { %v2718_v25 = vpop.eup %2717 }
 0x2ef   : > { %v1419_v1 = vmul.f32 0.6931472, %v2718_v25  ;;  %v1357_v16 = vpop.xlane.xlu1 %1356 }
 0x2f0   : > { %2719 = vlog2.f32 %v1357_v16 }
 0x2f1   : > { %v1463_v48 = vadd.f32 %v1419_v1, %v3710_v32 }
 0x2f3   : > { %v1753_v33 = vsub.f32 %v1463_v48, %v3708_v34 }
 0x2f5   : > { %1786 = vst.msk [vmem:[%s3683_s14 + $0x98] sm:$0xff] %vm1766_vm8, %v1753_v33 }
 0x2f6   : > { %v2720_v58 = vpop.eup %2719  ;;  %v1359_v17 = vpop.xlane.xlu2 %1358 }
 0x2f7   : > { %v1421_v44 = vmul.f32 0.6931472, %v2720_v58  ;;  %2721 = vlog2.f32 %v1359_v17 }
 0x2f9   : > { %v1464_v7 = vadd.f32 %v1421_v44, %v3720_v60 }
 0x2fb   : > { %v1754_v0 = vsub.f32 %v1464_v7, %v3718_v31 }
 0x2fd   : > { %v2722_v50 = vpop.eup %2721  ;;  %1787 = vst.msk [vmem:[%s3683_s14 + $0xa0] sm:$0xff] %vm1766_vm8, %v1754_v0 }
 0x2fe   : > { %v1423_v19 = vmul.f32 0.6931472, %v2722_v50 }
 0x300   : > { %v1465_v45 = vadd.f32 %v1423_v19, %v3728_v63 }
 0x302   : > { %v1755_v32 = vsub.f32 %v1465_v45, %v3732_v10 }
 0x304   : > { %1788 = vst.msk [vmem:[%s3683_s14 + $0xa8] sm:$0xff] %vm1766_vm8, %v1755_v32 }
 0x306   : > { %v1361_v34 = vpop.xlane.xlu0 %1360 }
 0x307   : > { %2723 = vlog2.f32 %v1361_v34  ;;  %v1363_v12 = vpop.xlane.xlu1 %1362 }
 0x308   : > { %2725 = vlog2.f32 %v1363_v12 }
 0x30d   : > { %v2724_v46 = vpop.eup %2723 }
 0x30e   : > { %v2726_v60 = vpop.eup %2725  ;;  %v1425_v61 = vmul.f32 0.6931472, %v2724_v46 }
 0x30f   : > { %v1427_v31 = vmul.f32 0.6931472, %v2726_v60 }
 0x310   : > { %v1466_v59 = vadd.f32 %v1425_v61, %v3744_v20  ;;  %v1365_v2 = vpop.xlane.xlu2 %1364 }
 0x311   : > { %v1467_v63 = vadd.f32 %v1427_v31, %v3748_v36  ;;  %2727 = vlog2.f32 %v1365_v2 }
 0x312   : > { %v1756_v10 = vsub.f32 %v1466_v59, %v3734_v35 }
 0x313   : > { %v1757_v49 = vsub.f32 %v1467_v63, %v3752_v23 }
 0x314   : > { %1789 = vst.msk [vmem:[%s3683_s14 + $0xb0] sm:$0xff] %vm1766_vm8, %v1756_v10 }
 0x315   : > { %1790 = vst.msk [vmem:[%s3683_s14 + $0xb8] sm:$0xff] %vm1766_vm8, %v1757_v49 }
 0x316   : > { %v1367_v6 = vpop.xlane.xlu0 %1366 }
 0x317   : > { %v2728_v11 = vpop.eup %2727  ;;  %2729 = vlog2.f32 %v1367_v6 }
 0x318   : > { %v1429_v38 = vmul.f32 0.6931472, %v2728_v11  ;;  %v1369_v22 = vpop.xlane.xlu1 %1368 }
 0x31a   : > { %v1468_v37 = vadd.f32 %v1429_v38, %v3758_v57 }
 0x31c   : > { %v1758_v20 = vsub.f32 %v1468_v37, %v3829_v39 }
 0x31d   : > { %v2730_v4 = vpop.eup %2729 }
 0x31e   : > { %1791 = vst.msk [vmem:[%s3683_s14 + $0xc0] sm:$0xff] %vm1766_vm8, %v1758_v20  ;;  %v1431_v36 = vmul.f32 0.6931472, %v2730_v4 }
 0x320   : > { %v1469_v35 = vadd.f32 %v1431_v36, %v3762_v30  ;;  %v1371_v42 = vpop.xlane.xlu2 %1370 }
 0x321   : > { %2731 = vlog2.f32 %v1371_v42 }
 0x322   : > { %v1759_v23 = vsub.f32 %v1469_v35, %v3841_v41 }
 0x324   : > { %1792 = vst.msk [vmem:[%s3683_s14 + $0xc8] sm:$0xff] %vm1766_vm8, %v1759_v23 }
 0x327   : > { %v1373_v13 = vpop.xlane.xlu0 %1372  ;;  %v2732_v18 = vpop.eup %2731 }
 0x328   : > { %2733 = vlog2.f32 %v1373_v13  ;;  %v1435_v57 = vmul.f32 0.6931472, %v2732_v18 }
 0x329   : > { %2735 = vlog2.f32 %v1369_v22 }
 0x32a   : > { %v1471_v39 = vadd.f32 %v1435_v57, %v3778_v51 }
 0x32e   : > { %v2734_v52 = vpop.eup %2733 }
 0x32f   : > { %v1437_v41 = vmul.f32 0.6931472, %v2734_v52  ;;  %v2736_v8 = vpop.eup %2735 }
 0x330   : > { %v1375_v55 = vpop.xlane.xlu1 %1374  ;;  %v1433_v43 = vmul.f32 0.6931472, %v2736_v8 }
 0x331   : > { %v1472_v29 = vadd.f32 %v1437_v41, %v3786_v47 }
 0x332   : > { %v1470_v47 = vadd.f32 %v1433_v43, %v3767_v54 }
 0x338   : > { %v1377_v14 = vpop.xlane.xlu2 %1376  ;;  %v1725_v5 = vpop.xlane.xlu1 %1724 }
 0x339   : > { %2737 = vlog2.f32 %v1377_v14  ;;  %v1761_v30 = vsub.f32 %v1471_v39, %v1725_v5 }
 0x33b   : > { %1794 = vst.msk [vmem:[%s3683_s14 + $0xd8] sm:$0xff] %vm1766_vm8, %v1761_v30 }
 0x33f   : > { %v2738_v56 = vpop.eup %2737  ;;  %v1379_v9 = vpop.xlane.xlu0 %1378 }
 0x340   : > { %v1441_v62 = vmul.f32 0.6931472, %v2738_v56  ;;  %v1727_v40 = vpop.xlane.xlu2 %1726  ;;  %2739 = vlog2.f32 %v1379_v9  ;;  %v1731_v28 = vpop.xlane.xlu1 %1730 }
 0x341   : > { %2741 = vlog2.f32 %v1375_v55  ;;  %v1762_v51 = vsub.f32 %v1472_v29, %v1727_v40 }
 0x342   : > { %v1474_v15 = vadd.f32 %v1441_v62, %v3802_v53 }
 0x343   : > { %1795 = vst.msk [vmem:[%s3683_s14 + $0xe0] sm:$0xff] %vm1766_vm8, %v1762_v51 }
 0x344   : > { %v1764_v27 = vsub.f32 %v1474_v15, %v1731_v28 }
 0x346   : > { %v2740_v26 = vpop.eup %2739  ;;  %1797 = vst.msk [vmem:[%s3683_s14 + $0xf0] sm:$0xff] %vm1766_vm8, %v1764_v27 }
 0x347   : > { %v2742_v3 = vpop.eup %2741  ;;  %v1443_v25 = vmul.f32 0.6931472, %v2740_v26  ;;  %v1723_v1 = vpop.xlane.xlu0 %1722 }
 0x348   : > { %v1760_v16 = vsub.f32 %v1470_v47, %v1723_v1  ;;  %v1439_v33 = vmul.f32 0.6931472, %v2742_v3  ;;  %v1733_v53 = vpop.xlane.xlu2 %1732 }
 0x349   : > { %v1475_v48 = vadd.f32 %v1443_v25, %v3810_v24 }
 0x34a   : > { %1793 = vst.msk [vmem:[%s3683_s14 + $0xd0] sm:$0xff] %vm1766_vm8, %v1760_v16  ;;  %v1473_v17 = vadd.f32 %v1439_v33, %v3794_v21 }
 0x34b   : > { %v1765_v58 = vsub.f32 %v1475_v48, %v1733_v53 }
 0x34d   : > { %1798 = vst.msk [vmem:[%s3683_s14 + $0xf8] sm:$0xff] %vm1766_vm8, %v1765_v58 }
 0x34e   : > { %1810 = sbr.rel (!%p2965_p5) target bundleno = 915 (0x393), region = 48 }
 0x34f   : > { %v1729_v44 = vpop.xlane.xlu0 %1728 }
 0x350   : > { %v1763_v7 = vsub.f32 %v1473_v17, %v1729_v44 }
 0x352   : > { %1796 = vst.msk [vmem:[%s3683_s14 + $0xe8] sm:$0xff] %vm1766_vm8, %v1763_v7 }
 0x353   : > { %s4137_s18 = smov (!%p1813_p11, %s1812_s18), 32 }
 0x354   : > { %s2354_s22 = sshll.u32 %s4137_s18, 3 }
 0x355   : > { %p2357_p12 = scmp.eq.s32.totalorder %s2354_s22, 0 }
 0x356   : > { %s3916_s29 = sshrl.u32 (!%p2357_p12), %s4137_s18, 5 }
 0x357   : > { %1821 = sbr.rel (%p2357_p12) target bundleno = 915 (0x393), region = 52  ;;  %p2358_p13 = scmp.le.s32.totalorder (!%p2357_p12), %s3916_s29, 0 }
 0x35c   : > { %2154 = sbr.rel (%p2358_p13) target bundleno = 898 (0x382), region = 148  ;;  %s4124_s9 = smov (!%p2358_p13), %s3910_s16 }
 0x35d   : > { %s4125_s13 = smov (!%p2358_p13), %s3683_s14  ;;  %s3925_s19 = smov (!%p2358_p13), 0  }
 0x35e   : > { %s3927_s21 = smov (!%p2358_p13), 0  }
 0x361 LB: >> { %v1946_v54 = vld [vmem:[%s2857_s13] sm:$0xff]  ;;  %v1948_v21 = vld [vmem:[%s2857_s13 + $0x8] sm:$0xff]  ;;  %v1950_v24 = vld [vmem:[%s2857_s13 + $0x10] sm:$0xff]  ;;  %s2010_s8 = sadd.s32 1, %s2861_s19  ;;  %s1940_s21 = sadd.s32 1, %s2865_s21   ;;  %s2865_s21 = sphi %s3927_s21, %s1940_s21   ;;  %s2861_s19 = sphi %s3925_s19, %s4128_s19   ;;  %s2857_s13 = sphi %s4125_s13, %s4127_s13   ;;  %s2853_s9 = sphi %s4124_s9, %s4126_s9  }
 0x362   : >> { %1947 = vst [vmem:[%s2853_s9] sm:$0xff] %v1946_v54  ;;  %v1952_v0 = vld [vmem:[%s2857_s13 + $0x18] sm:$0xff]  ;;  %p2011_p0 = scmp.ge.s32.totalorder %s2010_s8, %s3916_s29  ;;  %v1954_v50 = vld [vmem:[%s2857_s13 + $0x20] sm:$0xff]  ;;  %v1956_v19 = vld [vmem:[%s2857_s13 + $0x28] sm:$0xff]  ;;  %p1939_p1 = scmp.ge.s32.totalorder %s1940_s21, %s3916_s29 }
 0x363   : >> { %1949 = vst [vmem:[%s2853_s9 + $0x8] sm:$0xff] %v1948_v21  ;;  %v1958_v45 = vld [vmem:[%s2857_s13 + $0x30] sm:$0xff]  ;;  %v1960_v32 = vld [vmem:[%s2857_s13 + $0x38] sm:$0xff]  ;;  %v1962_v34 = vld [vmem:[%s2857_s13 + $0x40] sm:$0xff] }
 0x364   : >> { %1951 = vst [vmem:[%s2853_s9 + $0x10] sm:$0xff] %v1950_v24  ;;  %s4139_s8 = smov (%p2011_p0, %s2010_s8), 0  ;;  %v1964_v12 = vld [vmem:[%s2857_s13 + $0x48] sm:$0xff]  ;;  %v1966_v46 = vld [vmem:[%s2857_s13 + $0x50] sm:$0xff]  ;;  %v1968_v60 = vld [vmem:[%s2857_s13 + $0x58] sm:$0xff] }
 0x365   : >> { %1953 = vst [vmem:[%s2853_s9 + $0x18] sm:$0xff] %v1952_v0  ;;  %s2359_s22 = sshll.u32 %s4139_s8, 8  ;;  %v1970_v61 = vld [vmem:[%s2857_s13 + $0x60] sm:$0xff]  ;;  %v1972_v31 = vld [vmem:[%s2857_s13 + $0x68] sm:$0xff]  ;;  %v1974_v59 = vld [vmem:[%s2857_s13 + $0x70] sm:$0xff] }
 0x366   : >> { %1955 = vst [vmem:[%s2853_s9 + $0x20] sm:$0xff] %v1954_v50  ;;  %s3959_s19 = scalar_lea.vmem %s3683_s14, %s2359_s22 [#allocation2]   ;;  %s3962_s15 = scalar_lea.vmem %s3910_s16, %s2359_s22   ;;  %v1976_v2 = vld [vmem:[%s2857_s13 + $0x78] sm:$0xff]  ;;  %v1978_v63 = vld [vmem:[%s2857_s13 + $0x80] sm:$0xff]  ;;  %v1980_v10 = vld [vmem:[%s2857_s13 + $0x88] sm:$0xff] }
 0x367   : >> { %1957 = vst [vmem:[%s2853_s9 + $0x28] sm:$0xff] %v1956_v19  ;;  %v1982_v49 = vld [vmem:[%s2857_s13 + $0x90] sm:$0xff]  ;;  %v1984_v6 = vld [vmem:[%s2857_s13 + $0x98] sm:$0xff]  ;;  %v1986_v11 = vld [vmem:[%s2857_s13 + $0xa0] sm:$0xff] }
 0x368   : >> { %1959 = vst [vmem:[%s2853_s9 + $0x30] sm:$0xff] %v1958_v45  ;;  %v1988_v38 = vld [vmem:[%s2857_s13 + $0xa8] sm:$0xff]  ;;  %v1990_v37 = vld [vmem:[%s2857_s13 + $0xb0] sm:$0xff]  ;;  %v1992_v20 = vld [vmem:[%s2857_s13 + $0xb8] sm:$0xff] }
 0x369   : >> { %1961 = vst [vmem:[%s2853_s9 + $0x38] sm:$0xff] %v1960_v32  ;;  %v1994_v4 = vld [vmem:[%s2857_s13 + $0xc0] sm:$0xff]  ;;  %v1996_v36 = vld [vmem:[%s2857_s13 + $0xc8] sm:$0xff]  ;;  %v1998_v35 = vld [vmem:[%s2857_s13 + $0xd0] sm:$0xff] }
 0x36a   : >> { %1963 = vst [vmem:[%s2853_s9 + $0x40] sm:$0xff] %v1962_v34  ;;  %v2000_v23 = vld [vmem:[%s2857_s13 + $0xd8] sm:$0xff]  ;;  %v2002_v42 = vld [vmem:[%s2857_s13 + $0xe0] sm:$0xff]  ;;  %v2004_v22 = vld [vmem:[%s2857_s13 + $0xe8] sm:$0xff] }
 0x36b   : >> { %1965 = vst [vmem:[%s2853_s9 + $0x48] sm:$0xff] %v1964_v12  ;;  %v2006_v13 = vld [vmem:[%s2857_s13 + $0xf0] sm:$0xff]  ;;  %v2008_v18 = vld [vmem:[%s2857_s13 + $0xf8] sm:$0xff]  ;;  %s4127_s13 = smov %s3959_s19  ;;  %s4128_s19 = smov %s4139_s8 }
 0x36c   : >> { %1967 = vst [vmem:[%s2853_s9 + $0x50] sm:$0xff] %v1966_v46 }
 0x36d   : >> { %1969 = vst [vmem:[%s2853_s9 + $0x58] sm:$0xff] %v1968_v60 }
 0x36e   : >> { %1971 = vst [vmem:[%s2853_s9 + $0x60] sm:$0xff] %v1970_v61 }
 0x36f   : >> { %1973 = vst [vmem:[%s2853_s9 + $0x68] sm:$0xff] %v1972_v31 }
 0x370   : >> { %1975 = vst [vmem:[%s2853_s9 + $0x70] sm:$0xff] %v1974_v59 }
 0x371   : >> { %1977 = vst [vmem:[%s2853_s9 + $0x78] sm:$0xff] %v1976_v2 }
 0x372   : >> { %1979 = vst [vmem:[%s2853_s9 + $0x80] sm:$0xff] %v1978_v63 }
 0x373   : >> { %1981 = vst [vmem:[%s2853_s9 + $0x88] sm:$0xff] %v1980_v10 }
 0x374   : >> { %1983 = vst [vmem:[%s2853_s9 + $0x90] sm:$0xff] %v1982_v49 }
 0x375   : >> { %1985 = vst [vmem:[%s2853_s9 + $0x98] sm:$0xff] %v1984_v6 }
 0x376   : >> { %1987 = vst [vmem:[%s2853_s9 + $0xa0] sm:$0xff] %v1986_v11 }
 0x377   : >> { %1989 = vst [vmem:[%s2853_s9 + $0xa8] sm:$0xff] %v1988_v38 }
 0x378   : >> { %1991 = vst [vmem:[%s2853_s9 + $0xb0] sm:$0xff] %v1990_v37 }
 0x379   : >> { %1993 = vst [vmem:[%s2853_s9 + $0xb8] sm:$0xff] %v1992_v20 }
 0x37a   : >> { %1995 = vst [vmem:[%s2853_s9 + $0xc0] sm:$0xff] %v1994_v4 }
 0x37b   : >> { %1997 = vst [vmem:[%s2853_s9 + $0xc8] sm:$0xff] %v1996_v36 }
 0x37c   : >> { %1999 = vst [vmem:[%s2853_s9 + $0xd0] sm:$0xff] %v1998_v35 }
 0x37d   : >> { %2001 = vst [vmem:[%s2853_s9 + $0xd8] sm:$0xff] %v2000_v23  ;;  %1942 = sbr.rel (!%p1939_p1) target bundleno = 865 (0x361), region = 154 }
 0x37e   : >> { %2003 = vst [vmem:[%s2853_s9 + $0xe0] sm:$0xff] %v2002_v42 }
 0x37f   : >> { %2005 = vst [vmem:[%s2853_s9 + $0xe8] sm:$0xff] %v2004_v22 }
 0x380   : >> { %2007 = vst [vmem:[%s2853_s9 + $0xf0] sm:$0xff] %v2006_v13 }
 0x381   : >> { %2009 = vst [vmem:[%s2853_s9 + $0xf8] sm:$0xff] %v2008_v18  ;;  %s4126_s9 = smov %s3962_s15 }
 0x382 PF: > { %s4027_s22 = sand.u32 31, %s4137_s18   ;;  %s2408_s0 = sshll.u32 %s3916_s29, 8 }
 0x383   : > { %s2021_s1 = scalar_lea.vmem %s3683_s14, %s2408_s0 [#allocation2]   ;;  %s2023_s2 = scalar_lea.vmem %s3910_s16, %s2408_s0  }
 0x384   : > { %p2364_p2 = scmp.le.s32.totalorder %s4027_s22, 0 }
 0x385   : > { %s2867_s15 = smov (!%p2364_p2), %s2023_s2   ;;  %s2871_s3 = smov (!%p2364_p2), %s2021_s1  }
 0x386   : > { %2168 = sbr.rel (%p2364_p2) target bundleno = 915 (0x393), region = 159  ;;  %s2875_s4 = smov (!%p2364_p2), 0  }
 0x387   : > { %s2879_s8 = smov (!%p2364_p2), 0  }
 0x38b LB: >> { %v2033_v55 = vld [vmem:[%s2873_s3] sm:$0xff]  ;;  %s2035_s18 = sadd.s32 1, %s2877_s4  ;;  %s2027_s8 = sadd.s32 1, %s2881_s8   ;;  %s2881_s8 = sphi %s2879_s8, %s2027_s8   ;;  %s2877_s4 = sphi %s2875_s4, %s2876_s4   ;;  %s2873_s3 = sphi %s2871_s3, %s2040_s3   ;;  %s2869_s15 = sphi %s2867_s15, %s2041_s15  }
 0x38c   : >> { %2034 = vst [vmem:[%s2869_s15] sm:$0xff] %v2033_v55  ;;  %p2036_p3 = scmp.ge.s32.totalorder %s2035_s18, %s4027_s22  ;;  %p2026_p4 = scmp.ge.s32.totalorder %s2027_s8, %s4027_s22 }
 0x38e   : >> { %s4141_s18 = smov (%p2036_p3, %s2035_s18), 0  ;;  %2029 = sbr.rel (!%p2026_p4) target bundleno = 907 (0x38b), region = 165 }
 0x38f   : >> { %s2365_s0 = sshll.u32 %s4141_s18, 3  ;;  %s2876_s4 = smov %s4141_s18  }
 0x390   : >> { %s2040_s3 = scalar_lea.vmem %s2021_s1, %s2365_s0 [#allocation2]   ;;  %s2041_s15 = scalar_lea.vmem %s2023_s2, %s2365_s0  }
 0x393 PF: > { %2047 = sbr.rel (!%p2965_p5) target bundleno = 952 (0x3b8), region = 100  ;;  %s2049_s4 = ssub.s32 (%p2965_p5), 40, %s3024_s17 }
 0x394   : > { %p2050_p7 = scmp.lt.s32.totalorder (%p2965_p5), %s2049_s4, 32  ;;  %s4129_s3 = scalar_lea.sflag (%p2965_p5), [#allocation4], %s3235_s20 }
 0x398   : > { %s4143_s4 = smov (!%p2050_p7, %s2049_s4), 32 }
 0x399   : > { %s2368_s14 = sshll.u32 %s4143_s4, 2 }
 0x39a   : > { %s2053_s16 = ssub.s32 128, %s2368_s14 }
 0x39b   : > { %s2054_s29 = sshll.u32 %s2053_s16, 4 }
 0x39c   : > { %2055 = vsyncadd %s4129_s3, %s2054_s29  ;;  %p4043_p8 = scmp.ne.s32.totalorder %s2368_s14, 0  ;;  %s2410_s2 = sshll.u32 %s2948_s28, 7 }
 0x39d   : > { %s2058_s9 = scalar_lea.hbm %s4103_s7, %s2410_s2  ;;  %s2060_s13 = sshll.u32 %s3275_s23, 4  ;;  %s4052_s13 = int_to_ptr.vmem [resolvable:$true] %s2060_s13 }
 0x39e   : > { %s2062_s21 = sshll.u32 %s2058_s9, 4  ;;  %s2372_s19 = sshll.u32 %s4143_s4, 6  ;;  %s4054_s21 = int_to_ptr.hbm [resolvable:$true] %s2062_s21 }
 0x39f   : > { %s2744_s22 = sshra.s32 %s4052_s13, 4  ;;  %s2746_s15 = sshrl.u32 %s2372_s19, 4  ;;  %s2745_s22 = int_to_ptr.vmem [resolvable:$true] %s2744_s22 }
 0x3a0   : > { %s2751_s8 = scalar_lea.vmem %s2745_s22, %s2746_s15  ;;  %s2884_s28 = smov [#allocation3]  }
 0x3a1   : > { %p2752_p5 = scmp.ne.s32.totalorder %s2745_s22, %s2751_s8  ;;  %s2755_s18 = scalar_lea.vmem %s2884_s28, 256 }
 0x3a2   : > { %p2757_p11 = scmp.lt.s32.totalorder %s2755_s18, %s2751_s8 }
 0x3a3   : > { %p2753_p9 = pnand %p2752_p5, %p4043_p8 }
 0x3a5   : > { %p2754_p10 = pneg %p2753_p9 }
 0x3a7   : > { %p2759_p12 = pnand %p2757_p11, %p2754_p10 }
 0x3a9   : > { %2762 = shalt.err (!%p2759_p12)
}
 0x3aa   : > { %s2763_s23 = sshra.s32 %s4054_s21, 4  ;;  %s2774_s29 = scalar_lea.hbm %s4103_s7, 160  ;;  %s2764_s23 = int_to_ptr.hbm [resolvable:$true] %s2763_s23 }
 0x3ab   : > { %s2770_s0 = scalar_lea.hbm %s2764_s23, %s2746_s15  ;;  %p2775_p2 = scmp.lt.s32.totalorder %s2764_s23, %s4103_s7 }
 0x3ac   : > { %p2771_p13 = scmp.ne.s32.totalorder %s2764_s23, %s2770_s0  ;;  %p2776_p3 = scmp.lt.s32.totalorder %s2774_s29, %s2770_s0 }
 0x3ae   : > { %p2772_p0 = pnand %p2771_p13, %p4043_p8  ;;  %p2777_p4 = por %p2776_p3, %p2775_p2 }
 0x3b0   : > { %p2773_p1 = pneg %p2772_p0 }
 0x3b2   : > { %p2778_p7 = pnand %p2777_p4, %p2773_p1 }
 0x3b4   : > { %2781 = shalt.err (!%p2778_p7)
}
 0x3b5   : > { %s2885_s11 = smov 64   ;;  %s2886_s17 = smov 4  }
 0x3b6   : > { %s4131_s9 = scalar_lea.sflag [#allocation4], %s3235_s20 }
 0x3b7   : > { %2068 = dma.vmem_to_hbm [thread:$0]  (%p4043_p8), %s4052_s13, %s2372_s19, %s4054_s21, %s4131_s9, %s2885_s11, %s2885_s11, %s2886_s17  }
 0x3b8 PF: > { %p2511_p5 = scmp.ge.s32.totalorder %s2849_s27, 2  ;;  %s2084_s22 = sand.u32 1, %s2837_s24  }
 0x3b9   : > { %s2085_s15 = scalar_lea.sflag [#allocation4], %s2084_s22 }
 0x3ba   : > { %p2508_p9 = pnand %p2511_p5, %p2969_p6 }
 0x3bc   : > { %p2509_p10 = pneg %p2508_p9 }
 0x3be   : > { %2832 = dma.done.wait (%p2509_p10), %s2085_s15, 2048  }
 0x3bf   : > { %2834 = vsyncadd (%p2509_p10), %s2085_s15, 4294965248  ;;  %p18_p11 = scmp.ge.s32.totalorder %s2952_s30, 4   ;;  %s4132_s24 = smov %s2841_s25 }
 0x3c0   : > { %s4133_s25 = smov %s2845_s26  ;;  %s4134_s26 = smov %s2963_s10 }
 0x3c1   : > { %s4135_s27 = smov %s2952_s30  ;;  %20 = sbr.rel (!%p18_p11) target bundleno = 9 (0x9), region = 176 }
 0x3c6   :  { %2091 = vsyncpa [#allocation4], 1 }
 0x3c7   :  { %2093 = vsyncpa [#allocation4 + $0x1], 1 }

</bundles_post_ra>
